<compile_context>
chip_gen: v5e
topology: v5e:2x2
jax: 0.10.0
libtpu: 0.0.40
codegen_flags: <defaults>
</compile_context>

<pallas_src>
import math
import numpy as np
import jax
import jax.numpy as jnp
from jax.experimental import pallas as pl
from jax.experimental.pallas import tpu as pltpu

# ----- model configuration (mirrors DLASSO_GNNHyp.__init__) -----
B = 2            # batch size
P = 4            # number of agents / graph nodes
M = 8            # rows of each A_p
N = 8            # signal dimension n
HIDDEN = 32      # args.GHyp_hidden
K = 3            # args.GHN_iter_num
DADMM_MODE = "same"                 # -> hyp_shape = (K, 1, 4)
HYP_SIZE = K * 4                    # PDIM == 1 for "same" mode
ALPHA_MAX, TAU_MAX, RHO_MAX, ETA_MAX = 0.5, 0.5, 1.0, 1.0
NEG_SLOPE = 0.01                    # LeakyReLU default slope

F_IN = P * M                        # encoder input width  (32)
F1 = P * HIDDEN                     # 128
F2 = 2 * P * HIDDEN                 # 256
F3 = 4 * P * HIDDEN                 # 512
NODE_F = 4 * HIDDEN                 # per-node feature width (128, lane aligned)
GCN_H = 2 * HIDDEN                  # 64
PN = P * N                          # flattened per-batch DADMM state width (32)

# --- static weight/operator slab row offsets (lane-padded to 128) ---
S_WE1, S_WC1, S_WC2, S_WF1, S_WF2, S_ATA = 0, 32, 160, 224, 288, 320
SMAT_ROWS = 352
# --- bias slab lane offsets (each segment starts on a 128-lane boundary) ---
L_BE1, L_BE2, L_BE3, L_BC1, L_BC2, L_BF1, L_BF2, L_MAXP = (
    0, 128, 384, 896, 1024, 1152, 1280, 1408)
BIAS_LANES = 1536
# --- per-call dynamic slab row offsets (8-row aligned, lane-padded to 128) ---
R_BFLAT, R_ATB, R_Y0, R_U0, R_D0, R_SUMN, R_POOL, R_AHAT, R_LK0, R_LK1 = (
    0, 8, 16, 24, 32, 40, 48, 56, 64, 96)
DYN_ROWS = 128


def _leaky(v):
    return jnp.where(v >= 0, v, NEG_SLOPE * v)


def _sigmoid(v):
    # numerically stable sigmoid via tanh (runs on the EUP): 1/(1+exp(-v));
    # not bit-identical to torch.sigmoid but well under the 1e-3 tolerance.
    return 0.5 * (jnp.tanh(0.5 * v) + 1.0)


# --------------------------------------------------------------------------
# Single fused kernel: GNN hypernetwork + K DADMM/DLASSO iterations.
# --------------------------------------------------------------------------
def fused_kernel(smat_ref, bias_ref, dyn_ref, we2_hbm, we3_hbm,
                 y_out_ref,
                 we2_vm, we3_vm, node_scr, dma_sem):
    f32 = jnp.float32

    # Kick off the two large (bf16) weight DMAs immediately; they overlap with
    # the encoder layer-1 matmul and the small-slab loads below.
    cp2 = pltpu.make_async_copy(we2_hbm, we2_vm, dma_sem.at[0])
    cp3 = pltpu.make_async_copy(we3_hbm, we3_vm, dma_sem.at[1])
    cp2.start()
    cp3.start()

    # ---- encoder MLP (whole batch at once; big weights bf16 on the MXU) ----
    bflat = dyn_ref[R_BFLAT:R_BFLAT + B, 0:F_IN]                           # (B, 32)
    we1 = smat_ref[S_WE1:S_WE1 + F_IN, 0:F1]                               # (32, 128)
    be1 = bias_ref[0:1, L_BE1:L_BE1 + F1]
    x = _leaky(jnp.dot(bflat, we1, preferred_element_type=f32) + be1)      # (B, 128)

    cp2.wait()
    be2 = bias_ref[0:1, L_BE2:L_BE2 + F2]
    x = _leaky(jnp.dot(x.astype(jnp.bfloat16), we2_vm[...],
                       preferred_element_type=f32) + be2)                  # (B, 256)

    cp3.wait()
    be3 = bias_ref[0:1, L_BE3:L_BE3 + F3]
    x = jnp.dot(x.astype(jnp.bfloat16), we3_vm[...],
                preferred_element_type=f32) + be3                          # (B, 512)

    # (B, P*NODE_F) -> (P*B, NODE_F) node slab, p-major rows (row = p*B + b),
    # built with 4 aligned sublane stores into VMEM scratch (no 8-way concat).
    for p in range(P):
        node_scr[p * B:(p + 1) * B, :] = x[:, p * NODE_F:(p + 1) * NODE_F]
    node = node_scr[...]                                                   # (8, 128)

    # ---- 2x GCNConv with block-diagonal normalized adjacency (p-major) ----
    ahat = dyn_ref[R_AHAT:R_AHAT + B * P, 0:B * P]                          # (8, 8)
    wc1 = smat_ref[S_WC1:S_WC1 + NODE_F, 0:GCN_H]
    bc1 = bias_ref[0:1, L_BC1:L_BC1 + GCN_H]
    h = _leaky(jnp.dot(ahat, jnp.dot(node, wc1, preferred_element_type=f32),
                       preferred_element_type=f32) + bc1)                  # (8, 64)
    wc2 = smat_ref[S_WC2:S_WC2 + GCN_H, 0:GCN_H]
    bc2 = bias_ref[0:1, L_BC2:L_BC2 + GCN_H]
    h = _leaky(jnp.dot(ahat, jnp.dot(h, wc2, preferred_element_type=f32),
                       preferred_element_type=f32) + bc2)                  # (8, 64)

    # global mean pool per graph as a (B, B*P) matmul (1/P folded into pool)
    pool = dyn_ref[R_POOL:R_POOL + B, 0:B * P]                              # (B, 8)
    pooled = jnp.dot(pool, h, preferred_element_type=f32)                   # (B, 64)
    wf1 = smat_ref[S_WF1:S_WF1 + GCN_H, 0:HIDDEN]
    bf1 = bias_ref[0:1, L_BF1:L_BF1 + HIDDEN]
    f = _leaky(jnp.dot(pooled, wf1, preferred_element_type=f32) + bf1)      # (B, 32)

    # fc2 with the cumsum-over-K already folded into (wf2 @ Tcum, bf2 @ Tcum):
    # one sigmoid + one scale on the full (B, K*4) tile, outside the loop.
    wf2c = smat_ref[S_WF2:S_WF2 + HIDDEN, 0:HYP_SIZE]
    bf2c = bias_ref[0:1, L_BF2:L_BF2 + HYP_SIZE]
    maxp = bias_ref[0:1, L_MAXP:L_MAXP + HYP_SIZE]
    prm = maxp * _sigmoid(jnp.dot(f, wf2c, preferred_element_type=f32) + bf2c)

    # ---- DADMM / DLASSO iterations on lane-dense (B, P*n) state ----
    # NOTE: right-multiplication by AtA / (L ⊗ I_n) relies on their symmetry.
    ata = smat_ref[S_ATA:S_ATA + PN, 0:PN]                                  # (32, 32)
    atb = dyn_ref[R_ATB:R_ATB + B, 0:PN]
    sumn = dyn_ref[R_SUMN:R_SUMN + B, 0:PN]
    lk0 = dyn_ref[R_LK0:R_LK0 + PN, 0:PN]
    lk1 = dyn_ref[R_LK1:R_LK1 + PN, 0:PN]
    y = dyn_ref[R_Y0:R_Y0 + B, 0:PN]
    U = dyn_ref[R_U0:R_U0 + B, 0:PN]
    delta = dyn_ref[R_D0:R_D0 + B, 0:PN]
    row_is_b0 = jax.lax.broadcasted_iota(jnp.int32, (B, 1), 0) == 0

    for k in range(K):
        c = 4 * k
        alpha = prm[:, c + 0:c + 1]
        tau = prm[:, c + 1:c + 2]
        rho = prm[:, c + 2:c + 3]
        eta = prm[:, c + 3:c + 4]

        atay = jnp.dot(y, ata, preferred_element_type=f32)                  # (B, PN)
        sgn = jnp.where(y > 0, 1.0, jnp.where(y < 0, -1.0, 0.0))
        grad = atay - atb + sgn * tau + U * sumn + delta * rho
        y = y - alpha * grad

        # delta = 2 * (L_b ⊗ I_n) y_b : compute both per-batch products on the
        # full (B, PN) tile, then a row select — no concat/relayout in loop.
        d_b0 = jnp.dot(y, lk0, preferred_element_type=f32)
        d_b1 = jnp.dot(y, lk1, preferred_element_type=f32)
        delta = 2.0 * jnp.where(row_is_b0, d_b0, d_b1)
        U = U + delta * eta

        y_out_ref[k] = y                                                    # lane-dense store


# --------------------------------------------------------------------------
# One-time static packing (model constants): weights, biases, AtA blockdiag,
# cumsum fold, bf16 casts of the two large encoder weights.
# --------------------------------------------------------------------------
def _lanes128(x):
    return jnp.pad(x, ((0, 0), (0, 128 - x.shape[1])))


def _seg(x, w):
    return jnp.pad(x, ((0, 0), (0, w - x.shape[1])))


def _pad_rows128(x):
    r, c = x.shape
    return jnp.pad(x, ((0, (-r) % 8), (0, 128 - c)))


def pack_static(params, A, max_param_vec):
    (we1, be1, we2, be2, we3, be3, wc1, bc1, wc2, bc2, wf1, bf1, wf2, bf2) = params
    A0 = A[0]
    eyeP = jnp.eye(P, dtype=jnp.float32)
    AtA = jnp.einsum('pmi,pmj->pij', A0, A0)                                # (P, n, n), symmetric
    ata_blk = jnp.einsum('pq,pij->piqj', eyeP, AtA).reshape(PN, PN)         # blockdiag(AtA_p)

    # cumsum over K folded into fc2: cum-logits = f @ (wf2 @ Tcum) + bf2 @ Tcum
    tc = np.zeros((HYP_SIZE, HYP_SIZE), np.float32)
    for kk in range(K):
        for kp in range(kk + 1):
            for cc in range(4):
                tc[kp * 4 + cc, kk * 4 + cc] = 1.0
    tcum = jnp.asarray(tc)
    wf2c = wf2 @ tcum                                                       # (HIDDEN, K*4)
    bf2c = bf2 @ tcum                                                       # (1, K*4)
    maxp_tile = jnp.tile(max_param_vec.reshape(1, 4), (1, K))               # (1, K*4)

    smat = jnp.concatenate([
        _lanes128(we1), _lanes128(wc1), _lanes128(wc2),
        _lanes128(wf1), _lanes128(wf2c), _lanes128(ata_blk)], axis=0)       # (352, 128)
    assert smat.shape == (SMAT_ROWS, 128), smat.shape

    bias = jnp.concatenate([
        _seg(be1, 128), _seg(be2, 256), _seg(be3, 512),
        _seg(bc1, 128), _seg(bc2, 128), _seg(bf1, 128),
        _seg(bf2c, 128), _seg(maxp_tile, 128)], axis=1)                     # (1, 1536)
    assert bias.shape == (1, BIAS_LANES), bias.shape

    return smat, bias, we2.astype(jnp.bfloat16), we3.astype(jnp.bfloat16)


# --------------------------------------------------------------------------
# Full forward: tiny jit-fused per-call glue + one pallas_call.
# --------------------------------------------------------------------------
@jax.jit
def forward(smat, bias, we2_bf16, we3_bf16, b, adj, A, y0, U0, d0):
    A0 = A[0]
    bflat = b.reshape(B, F_IN)
    atb = jnp.einsum('pmi,bpm->bpi', A0, b[..., 0]).reshape(B, PN)          # A^T b

    eyeP = jnp.eye(P, dtype=jnp.float32)
    eyeB = jnp.eye(B, dtype=jnp.float32)
    eyeN = jnp.eye(N, dtype=jnp.float32)

    # per-call graph operators
    a_self = adj + eyeP[None]
    dinv = 1.0 / jnp.sqrt(jnp.sum(a_self, axis=-1))
    ahat = a_self * dinv[:, :, None] * dinv[:, None, :]                     # D^-1/2 (A+I) D^-1/2
    # p-major node ordering (row = p*B + b): block-diagonal over batch
    ahat_pm = jnp.einsum('bpq,bc->pbqc', ahat, eyeB).reshape(P * B, P * B)
    pool_pm = jnp.broadcast_to(eyeB[:, None, :] / float(P), (B, P, B)).reshape(B, P * B)

    deg = jnp.sum(adj, axis=-1)                                             # (B, P)
    sumn = jnp.repeat(deg, N, axis=1)                                       # (B, P*n)
    lap = eyeP[None] * deg[:, :, None] - adj                                # L = D - A
    lkron = jnp.einsum('bpq,ij->bpiqj', lap, eyeN).reshape(B, PN, PN)       # L_b ⊗ I_n

    dyn = jnp.concatenate([
        _pad_rows128(bflat), _pad_rows128(atb),
        _pad_rows128(y0.reshape(B, PN)), _pad_rows128(U0.reshape(B, PN)),
        _pad_rows128(d0.reshape(B, PN)), _pad_rows128(sumn),
        _pad_rows128(pool_pm), _pad_rows128(ahat_pm),
        _pad_rows128(lkron[0]), _pad_rows128(lkron[1])], axis=0)            # (128, 128)

    vmem = pl.BlockSpec(memory_space=pltpu.MemorySpace.VMEM)
    anyspace = pl.BlockSpec(memory_space=pl.ANY)
    Y = pl.pallas_call(
        fused_kernel,
        out_shape=jax.ShapeDtypeStruct((K, B, PN), jnp.float32),
        in_specs=[vmem, vmem, vmem, anyspace, anyspace],
        out_specs=vmem,
        scratch_shapes=[
            pltpu.VMEM((F1, F2), jnp.bfloat16),       # we2 landing buffer
            pltpu.VMEM((F2, F3), jnp.bfloat16),       # we3 landing buffer
            pltpu.VMEM((B * P, NODE_F), jnp.float32),  # node slab
            pltpu.SemaphoreType.DMA((2,)),
        ],
    )(smat, bias, dyn, we2_bf16, we3_bf16)
    return Y.reshape(K, B, P, N, 1)


# --------------------------------------------------------------------------
# Pure-JAX reference (same math) used only as a correctness check.
# --------------------------------------------------------------------------
def reference_forward(b, adj, A, params, max_param_vec, y0, U0, d0):
    (we1, be1, we2, be2, we3, be3, wc1, bc1, wc2, bc2, wf1, bf1, wf2, bf2) = params
    x = b.reshape(B, F_IN)
    x = _leaky(x @ we1 + be1)
    x = _leaky(x @ we2 + be2)
    x = x @ we3 + be3
    node = x.reshape(B, P, NODE_F)
    a_self = adj + jnp.eye(P, dtype=jnp.float32)[None]
    dinv = 1.0 / jnp.sqrt(jnp.sum(a_self, axis=-1))
    ahat = a_self * dinv[:, :, None] * dinv[:, None, :]
    h = _leaky(jnp.einsum('bij,bjf->bif', ahat, node @ wc1) + bc1)
    h = _leaky(jnp.einsum('bij,bjf->bif', ahat, h @ wc2) + bc2)
    pooled = jnp.mean(h, axis=1)
    f = _leaky(pooled @ wf1 + bf1)
    f = f @ wf2 + bf2
    hyp = jnp.cumsum(f.reshape(B, K, 1, 4), axis=1)
    hyp = jax.nn.sigmoid(hyp) * max_param_vec.reshape(1, 1, 1, 4)

    A0 = A[0]
    AtA = jnp.einsum('pmi,pmj->pij', A0, A0)
    Atb = jnp.einsum('pmi,bpm->bpi', A0, b[..., 0])
    deg = jnp.sum(adj, axis=-1)
    sumn = deg[:, :, None]
    lap = jnp.eye(P, dtype=jnp.float32)[None] * deg[:, :, None] - adj
    y, U, delta = y0, U0, d0
    Ys = []
    for k in range(K):
        prm = hyp[:, k]                     # (B, 1, 4)
        alpha, tau, rho, eta = (prm[:, :, i:i + 1] for i in range(4))
        AtAy = jnp.sum(AtA[None] * y[:, :, None, :], axis=-1)
        grad = AtAy - Atb + jnp.sign(y) * tau + U * sumn + delta * rho
        y_next = y - alpha * grad
        delta = 2.0 * jnp.einsum('bpq,bqn->bpn', lap, y_next)
        U = U + delta * eta
        y = y_next
        Ys.append(y)
    return jnp.stack(Ys)[..., None]         # (K, B, P, N, 1)


# --------------------------------------------------------------------------
if __name__ == "__main__":
    key = jax.random.PRNGKey(0)
    ks = jax.random.split(key, 16)

    def dense(k, fi, fo, scale=None):
        scale = (1.0 / math.sqrt(fi)) if scale is None else scale
        return jax.random.normal(k, (fi, fo), jnp.float32) * scale

    params = (
        dense(ks[0], F_IN, F1), jnp.zeros((1, F1), jnp.float32),
        dense(ks[1], F1, F2), jnp.zeros((1, F2), jnp.float32),
        dense(ks[2], F2, F3), jnp.zeros((1, F3), jnp.float32),
        dense(ks[3], NODE_F, GCN_H), jnp.zeros((1, GCN_H), jnp.float32),
        dense(ks[4], GCN_H, GCN_H), jnp.zeros((1, GCN_H), jnp.float32),
        dense(ks[5], GCN_H, HIDDEN), jnp.zeros((1, HIDDEN), jnp.float32),
        dense(ks[6], HIDDEN, HYP_SIZE, scale=1e-7),          # fc2: N(0, 1e-7)
        jnp.full((1, HYP_SIZE), -10.0, jnp.float32),         # fc2 bias = -10
    )
    max_param_vec = jnp.array([ALPHA_MAX, TAU_MAX, RHO_MAX, ETA_MAX], jnp.float32)

    A = jax.random.normal(ks[10], (1, P, M, N), jnp.float32)
    b = jax.random.normal(ks[11], (B, P, M, 1), jnp.float32)
    y0 = 0.01 * jax.random.normal(ks[12], (B, P, N), jnp.float32)
    U0 = 0.01 * jax.random.normal(ks[13], (B, P, N), jnp.float32)
    d0 = 0.01 * jax.random.normal(ks[14], (B, P, N), jnp.float32)

    # graph_list as dense adjacency matrices: batch 0 = 4-cycle, batch 1 = K4
    adj_np = np.zeros((B, P, P), np.float32)
    for p in range(P):
        adj_np[0, p, (p + 1) % P] = 1.0
        adj_np[0, (p + 1) % P, p] = 1.0
    adj_np[1] = 1.0 - np.eye(P, dtype=np.float32)
    adj = jnp.asarray(adj_np)

    # one-time static packing (model constants), then the jitted forward
    smat, bias, we2_bf16, we3_bf16 = pack_static(params, A, max_param_vec)

    Y = forward(smat, bias, we2_bf16, we3_bf16, b, adj, A, y0, U0, d0)
    Y = jax.block_until_ready(Y)

    Y_ref = reference_forward(b, adj, A, params, max_param_vec, y0, U0, d0)
    err = float(jnp.max(jnp.abs(Y - Y_ref)))
    assert Y.shape == (K, B, P, N, 1), Y.shape
    assert err < 1e-3, f"max abs err {err}"
    print("KERNEL_OK")
</pallas_src>

<mosaic_0001>
module attributes {stable_mosaic.version = 11 : i64} {
  func.func @fused_kernel(%arg0: memref<352x128xf32, #tpu.memory_space<vmem>>, %arg1: memref<1x1536xf32, #tpu.memory_space<vmem>>, %arg2: memref<128x128xf32, #tpu.memory_space<vmem>>, %arg3: memref<128x256xbf16, #tpu.memory_space<any>>, %arg4: memref<256x512xbf16, #tpu.memory_space<any>>, %arg5: memref<3x2x32xf32, #tpu.memory_space<vmem>>, %arg6: memref<128x256xbf16, #tpu.memory_space<vmem>>, %arg7: memref<256x512xbf16, #tpu.memory_space<vmem>>, %arg8: memref<8x128xf32, #tpu.memory_space<vmem>>, %arg9: memref<2x!tpu.dma_semaphore, #tpu.memory_space<semaphore_mem>>) attributes {dimension_semantics = [], scalar_prefetch = 0 : i64, scratch_operands = 4 : i64, tpu.core_type = #tpu.core_type<tc>} {
    %c0_i32 = arith.constant 0 : i32
    %0 = tpu.memref_slice %arg9[%c0_i32] : memref<2x!tpu.dma_semaphore, #tpu.memory_space<semaphore_mem>> -> memref<1x!tpu.dma_semaphore, #tpu.memory_space<semaphore_mem>>
    %1 = tpu.memref_squeeze %0 : memref<1x!tpu.dma_semaphore, #tpu.memory_space<semaphore_mem>> -> memref<!tpu.dma_semaphore, #tpu.memory_space<semaphore_mem>>
    tpu.enqueue_dma source(%arg3 : memref<128x256xbf16, #tpu.memory_space<any>>) target(%arg6 : memref<128x256xbf16, #tpu.memory_space<vmem>>) target_semaphore(%1 : memref<!tpu.dma_semaphore, #tpu.memory_space<semaphore_mem>>)
    %c1_i32 = arith.constant 1 : i32
    %2 = tpu.memref_slice %arg9[%c1_i32] : memref<2x!tpu.dma_semaphore, #tpu.memory_space<semaphore_mem>> -> memref<1x!tpu.dma_semaphore, #tpu.memory_space<semaphore_mem>>
    %3 = tpu.memref_squeeze %2 : memref<1x!tpu.dma_semaphore, #tpu.memory_space<semaphore_mem>> -> memref<!tpu.dma_semaphore, #tpu.memory_space<semaphore_mem>>
    tpu.enqueue_dma source(%arg4 : memref<256x512xbf16, #tpu.memory_space<any>>) target(%arg7 : memref<256x512xbf16, #tpu.memory_space<vmem>>) target_semaphore(%3 : memref<!tpu.dma_semaphore, #tpu.memory_space<semaphore_mem>>)
    %c0 = arith.constant 0 : index
    %c0_0 = arith.constant 0 : index
    %4 = vector.load %arg2[%c0, %c0_0] : memref<128x128xf32, #tpu.memory_space<vmem>>, vector<2x32xf32>
    %c0_1 = arith.constant 0 : index
    %c0_2 = arith.constant 0 : index
    %5 = vector.load %arg0[%c0_1, %c0_2] : memref<352x128xf32, #tpu.memory_space<vmem>>, vector<32x128xf32>
    %c0_3 = arith.constant 0 : index
    %c0_4 = arith.constant 0 : index
    %6 = vector.load %arg1[%c0_3, %c0_4] : memref<1x1536xf32, #tpu.memory_space<vmem>>, vector<1x128xf32>
    %cst = arith.constant dense<0.000000e+00> : vector<2x128xf32>
    %7 = tpu.matmul %4, %5, %cst {dimension_numbers = #tpu.dot_dimension_numbers<[1], [0], [0], [1], [0, 0, 1, 1], [], []>} : vector<2x32xf32>, vector<32x128xf32>, vector<2x128xf32> -> vector<2x128xf32>
    %8 = vector.broadcast %6 : vector<1x128xf32> to vector<2x128xf32>
    %9 = arith.addf %7, %8 : vector<2x128xf32>
    %cst_5 = arith.constant 0.000000e+00 : f32
    %10 = vector.broadcast %cst_5 : f32 to vector<2x128xf32>
    %11 = arith.cmpf oge, %9, %10 : vector<2x128xf32>
    %cst_6 = arith.constant 0.00999999977 : f32
    %12 = vector.broadcast %cst_6 : f32 to vector<2x128xf32>
    %13 = arith.mulf %12, %9 : vector<2x128xf32>
    %14 = arith.select %11, %9, %13 : vector<2x128xi1>, vector<2x128xf32>
    %c0_i32_7 = arith.constant 0 : i32
    %15 = tpu.memref_slice %arg9[%c0_i32_7] : memref<2x!tpu.dma_semaphore, #tpu.memory_space<semaphore_mem>> -> memref<1x!tpu.dma_semaphore, #tpu.memory_space<semaphore_mem>>
    %16 = tpu.memref_squeeze %15 : memref<1x!tpu.dma_semaphore, #tpu.memory_space<semaphore_mem>> -> memref<!tpu.dma_semaphore, #tpu.memory_space<semaphore_mem>>
    tpu.wait_dma2 semaphore(%16 : memref<!tpu.dma_semaphore, #tpu.memory_space<semaphore_mem>>) src(%arg3 : memref<128x256xbf16, #tpu.memory_space<any>>) dst(%arg6 : memref<128x256xbf16, #tpu.memory_space<vmem>>)
    %c0_8 = arith.constant 0 : index
    %c128 = arith.constant 128 : index
    %17 = vector.load %arg1[%c0_8, %c128] : memref<1x1536xf32, #tpu.memory_space<vmem>>, vector<1x256xf32>
    %18 = arith.truncf %14 : vector<2x128xf32> to vector<2x128xbf16>
    %c0_9 = arith.constant 0 : index
    %c0_10 = arith.constant 0 : index
    %19 = vector.load %arg6[%c0_9, %c0_10] : memref<128x256xbf16, #tpu.memory_space<vmem>>, vector<128x256xbf16>
    %cst_11 = arith.constant dense<0.000000e+00> : vector<2x256xf32>
    %20 = tpu.matmul %18, %19, %cst_11 {dimension_numbers = #tpu.dot_dimension_numbers<[1], [0], [0], [1], [0, 0, 1, 1], [], []>} : vector<2x128xbf16>, vector<128x256xbf16>, vector<2x256xf32> -> vector<2x256xf32>
    %21 = vector.broadcast %17 : vector<1x256xf32> to vector<2x256xf32>
    %22 = arith.addf %20, %21 : vector<2x256xf32>
    %cst_12 = arith.constant 0.000000e+00 : f32
    %23 = vector.broadcast %cst_12 : f32 to vector<2x256xf32>
    %24 = arith.cmpf oge, %22, %23 : vector<2x256xf32>
    %cst_13 = arith.constant 0.00999999977 : f32
    %25 = vector.broadcast %cst_13 : f32 to vector<2x256xf32>
    %26 = arith.mulf %25, %22 : vector<2x256xf32>
    %27 = arith.select %24, %22, %26 : vector<2x256xi1>, vector<2x256xf32>
    %c1_i32_14 = arith.constant 1 : i32
    %28 = tpu.memref_slice %arg9[%c1_i32_14] : memref<2x!tpu.dma_semaphore, #tpu.memory_space<semaphore_mem>> -> memref<1x!tpu.dma_semaphore, #tpu.memory_space<semaphore_mem>>
    %29 = tpu.memref_squeeze %28 : memref<1x!tpu.dma_semaphore, #tpu.memory_space<semaphore_mem>> -> memref<!tpu.dma_semaphore, #tpu.memory_space<semaphore_mem>>
    tpu.wait_dma2 semaphore(%29 : memref<!tpu.dma_semaphore, #tpu.memory_space<semaphore_mem>>) src(%arg4 : memref<256x512xbf16, #tpu.memory_space<any>>) dst(%arg7 : memref<256x512xbf16, #tpu.memory_space<vmem>>)
    %c0_15 = arith.constant 0 : index
    %c384 = arith.constant 384 : index
    %30 = vector.load %arg1[%c0_15, %c384] : memref<1x1536xf32, #tpu.memory_space<vmem>>, vector<1x512xf32>
    %31 = arith.truncf %27 : vector<2x256xf32> to vector<2x256xbf16>
    %c0_16 = arith.constant 0 : index
    %c0_17 = arith.constant 0 : index
    %32 = vector.load %arg7[%c0_16, %c0_17] : memref<256x512xbf16, #tpu.memory_space<vmem>>, vector<256x512xbf16>
    %cst_18 = arith.constant dense<0.000000e+00> : vector<2x512xf32>
    %33 = tpu.matmul %31, %32, %cst_18 {dimension_numbers = #tpu.dot_dimension_numbers<[1], [0], [0], [1], [0, 0, 1, 1], [], []>} : vector<2x256xbf16>, vector<256x512xbf16>, vector<2x512xf32> -> vector<2x512xf32>
    %34 = vector.broadcast %30 : vector<1x512xf32> to vector<2x512xf32>
    %35 = arith.addf %33, %34 : vector<2x512xf32>
    %36 = vector.extract_strided_slice %35 {offsets = [0, 0], sizes = [2, 128], strides = [1, 1]} : vector<2x512xf32> to vector<2x128xf32>
    %c0_19 = arith.constant 0 : index
    %c0_20 = arith.constant 0 : index
    %37 = vector.load %arg8[%c0_19, %c0_20] : memref<8x128xf32, #tpu.memory_space<vmem>>, vector<2x128xf32>
    tpu.vector_store %arg8[%c0_19, %c0_20], %36 {strides = array<i32>} : memref<8x128xf32, #tpu.memory_space<vmem>>, vector<2x128xf32>,
    %38 = vector.extract_strided_slice %35 {offsets = [0, 128], sizes = [2, 128], strides = [1, 1]} : vector<2x512xf32> to vector<2x128xf32>
    %c2 = arith.constant 2 : index
    %c0_21 = arith.constant 0 : index
    %39 = vector.load %arg8[%c2, %c0_21] : memref<8x128xf32, #tpu.memory_space<vmem>>, vector<2x128xf32>
    tpu.vector_store %arg8[%c2, %c0_21], %38 {strides = array<i32>} : memref<8x128xf32, #tpu.memory_space<vmem>>, vector<2x128xf32>,
    %40 = vector.extract_strided_slice %35 {offsets = [0, 256], sizes = [2, 128], strides = [1, 1]} : vector<2x512xf32> to vector<2x128xf32>
    %c4 = arith.constant 4 : index
    %c0_22 = arith.constant 0 : index
    %41 = vector.load %arg8[%c4, %c0_22] : memref<8x128xf32, #tpu.memory_space<vmem>>, vector<2x128xf32>
    tpu.vector_store %arg8[%c4, %c0_22], %40 {strides = array<i32>} : memref<8x128xf32, #tpu.memory_space<vmem>>, vector<2x128xf32>,
    %42 = vector.extract_strided_slice %35 {offsets = [0, 384], sizes = [2, 128], strides = [1, 1]} : vector<2x512xf32> to vector<2x128xf32>
    %c6 = arith.constant 6 : index
    %c0_23 = arith.constant 0 : index
    %43 = vector.load %arg8[%c6, %c0_23] : memref<8x128xf32, #tpu.memory_space<vmem>>, vector<2x128xf32>
    tpu.vector_store %arg8[%c6, %c0_23], %42 {strides = array<i32>} : memref<8x128xf32, #tpu.memory_space<vmem>>, vector<2x128xf32>,
    %c0_24 = arith.constant 0 : index
    %c0_25 = arith.constant 0 : index
    %44 = vector.load %arg8[%c0_24, %c0_25] : memref<8x128xf32, #tpu.memory_space<vmem>>, vector<8x128xf32>
    %c56 = arith.constant 56 : index
    %c0_26 = arith.constant 0 : index
    %45 = vector.load %arg2[%c56, %c0_26] : memref<128x128xf32, #tpu.memory_space<vmem>>, vector<8x8xf32>
    %c32 = arith.constant 32 : index
    %c0_27 = arith.constant 0 : index
    %46 = vector.load %arg0[%c32, %c0_27] : memref<352x128xf32, #tpu.memory_space<vmem>>, vector<128x64xf32>
    %c0_28 = arith.constant 0 : index
    %c896 = arith.constant 896 : index
    %47 = vector.load %arg1[%c0_28, %c896] : memref<1x1536xf32, #tpu.memory_space<vmem>>, vector<1x64xf32>
    %cst_29 = arith.constant dense<0.000000e+00> : vector<8x64xf32>
    %48 = tpu.matmul %44, %46, %cst_29 {dimension_numbers = #tpu.dot_dimension_numbers<[1], [0], [0], [1], [0, 0, 1, 1], [], []>} : vector<8x128xf32>, vector<128x64xf32>, vector<8x64xf32> -> vector<8x64xf32>
    %cst_30 = arith.constant dense<0.000000e+00> : vector<8x64xf32>
    %49 = tpu.matmul %45, %48, %cst_30 {dimension_numbers = #tpu.dot_dimension_numbers<[1], [0], [0], [1], [0, 0, 1, 1], [], []>} : vector<8x8xf32>, vector<8x64xf32>, vector<8x64xf32> -> vector<8x64xf32>
    %50 = vector.broadcast %47 : vector<1x64xf32> to vector<8x64xf32>
    %51 = arith.addf %49, %50 : vector<8x64xf32>
    %cst_31 = arith.constant 0.000000e+00 : f32
    %52 = vector.broadcast %cst_31 : f32 to vector<8x64xf32>
    %53 = arith.cmpf oge, %51, %52 : vector<8x64xf32>
    %cst_32 = arith.constant 0.00999999977 : f32
    %54 = vector.broadcast %cst_32 : f32 to vector<8x64xf32>
    %55 = arith.mulf %54, %51 : vector<8x64xf32>
    %56 = arith.select %53, %51, %55 : vector<8x64xi1>, vector<8x64xf32>
    %c160 = arith.constant 160 : index
    %c0_33 = arith.constant 0 : index
    %57 = vector.load %arg0[%c160, %c0_33] : memref<352x128xf32, #tpu.memory_space<vmem>>, vector<64x64xf32>
    %c0_34 = arith.constant 0 : index
    %c1024 = arith.constant 1024 : index
    %58 = vector.load %arg1[%c0_34, %c1024] : memref<1x1536xf32, #tpu.memory_space<vmem>>, vector<1x64xf32>
    %cst_35 = arith.constant dense<0.000000e+00> : vector<8x64xf32>
    %59 = tpu.matmul %56, %57, %cst_35 {dimension_numbers = #tpu.dot_dimension_numbers<[1], [0], [0], [1], [0, 0, 1, 1], [], []>} : vector<8x64xf32>, vector<64x64xf32>, vector<8x64xf32> -> vector<8x64xf32>
    %cst_36 = arith.constant dense<0.000000e+00> : vector<8x64xf32>
    %60 = tpu.matmul %45, %59, %cst_36 {dimension_numbers = #tpu.dot_dimension_numbers<[1], [0], [0], [1], [0, 0, 1, 1], [], []>} : vector<8x8xf32>, vector<8x64xf32>, vector<8x64xf32> -> vector<8x64xf32>
    %61 = vector.broadcast %58 : vector<1x64xf32> to vector<8x64xf32>
    %62 = arith.addf %60, %61 : vector<8x64xf32>
    %cst_37 = arith.constant 0.000000e+00 : f32
    %63 = vector.broadcast %cst_37 : f32 to vector<8x64xf32>
    %64 = arith.cmpf oge, %62, %63 : vector<8x64xf32>
    %cst_38 = arith.constant 0.00999999977 : f32
    %65 = vector.broadcast %cst_38 : f32 to vector<8x64xf32>
    %66 = arith.mulf %65, %62 : vector<8x64xf32>
    %67 = arith.select %64, %62, %66 : vector<8x64xi1>, vector<8x64xf32>
    %c48 = arith.constant 48 : index
    %c0_39 = arith.constant 0 : index
    %68 = vector.load %arg2[%c48, %c0_39] : memref<128x128xf32, #tpu.memory_space<vmem>>, vector<2x8xf32>
    %cst_40 = arith.constant dense<0.000000e+00> : vector<2x64xf32>
    %69 = tpu.matmul %68, %67, %cst_40 {dimension_numbers = #tpu.dot_dimension_numbers<[1], [0], [0], [1], [0, 0, 1, 1], [], []>} : vector<2x8xf32>, vector<8x64xf32>, vector<2x64xf32> -> vector<2x64xf32>
    %c224 = arith.constant 224 : index
    %c0_41 = arith.constant 0 : index
    %70 = vector.load %arg0[%c224, %c0_41] : memref<352x128xf32, #tpu.memory_space<vmem>>, vector<64x32xf32>
    %c0_42 = arith.constant 0 : index
    %c1152 = arith.constant 1152 : index
    %71 = vector.load %arg1[%c0_42, %c1152] : memref<1x1536xf32, #tpu.memory_space<vmem>>, vector<1x32xf32>
    %cst_43 = arith.constant dense<0.000000e+00> : vector<2x32xf32>
    %72 = tpu.matmul %69, %70, %cst_43 {dimension_numbers = #tpu.dot_dimension_numbers<[1], [0], [0], [1], [0, 0, 1, 1], [], []>} : vector<2x64xf32>, vector<64x32xf32>, vector<2x32xf32> -> vector<2x32xf32>
    %73 = vector.broadcast %71 : vector<1x32xf32> to vector<2x32xf32>
    %74 = arith.addf %72, %73 : vector<2x32xf32>
    %cst_44 = arith.constant 0.000000e+00 : f32
    %75 = vector.broadcast %cst_44 : f32 to vector<2x32xf32>
    %76 = arith.cmpf oge, %74, %75 : vector<2x32xf32>
    %cst_45 = arith.constant 0.00999999977 : f32
    %77 = vector.broadcast %cst_45 : f32 to vector<2x32xf32>
    %78 = arith.mulf %77, %74 : vector<2x32xf32>
    %79 = arith.select %76, %74, %78 : vector<2x32xi1>, vector<2x32xf32>
    %c288 = arith.constant 288 : index
    %c0_46 = arith.constant 0 : index
    %80 = vector.load %arg0[%c288, %c0_46] : memref<352x128xf32, #tpu.memory_space<vmem>>, vector<32x12xf32>
    %c0_47 = arith.constant 0 : index
    %c1280 = arith.constant 1280 : index
    %81 = vector.load %arg1[%c0_47, %c1280] : memref<1x1536xf32, #tpu.memory_space<vmem>>, vector<1x12xf32>
    %c0_48 = arith.constant 0 : index
    %c1408 = arith.constant 1408 : index
    %82 = vector.load %arg1[%c0_48, %c1408] : memref<1x1536xf32, #tpu.memory_space<vmem>>, vector<1x12xf32>
    %cst_49 = arith.constant dense<0.000000e+00> : vector<2x12xf32>
    %83 = tpu.matmul %79, %80, %cst_49 {dimension_numbers = #tpu.dot_dimension_numbers<[1], [0], [0], [1], [0, 0, 1, 1], [], []>} : vector<2x32xf32>, vector<32x12xf32>, vector<2x12xf32> -> vector<2x12xf32>
    %84 = vector.broadcast %81 : vector<1x12xf32> to vector<2x12xf32>
    %85 = arith.addf %83, %84 : vector<2x12xf32>
    %cst_50 = arith.constant 5.000000e-01 : f32
    %86 = vector.broadcast %cst_50 : f32 to vector<2x12xf32>
    %87 = arith.mulf %86, %85 : vector<2x12xf32>
    %88 = math.tanh %87 : vector<2x12xf32>
    %cst_51 = arith.constant 1.000000e+00 : f32
    %89 = vector.broadcast %cst_51 : f32 to vector<2x12xf32>
    %90 = arith.addf %88, %89 : vector<2x12xf32>
    %cst_52 = arith.constant 5.000000e-01 : f32
    %91 = vector.broadcast %cst_52 : f32 to vector<2x12xf32>
    %92 = arith.mulf %91, %90 : vector<2x12xf32>
    %93 = vector.broadcast %82 : vector<1x12xf32> to vector<2x12xf32>
    %94 = arith.mulf %93, %92 : vector<2x12xf32>
    %c320 = arith.constant 320 : index
    %c0_53 = arith.constant 0 : index
    %95 = vector.load %arg0[%c320, %c0_53] : memref<352x128xf32, #tpu.memory_space<vmem>>, vector<32x32xf32>
    %c8 = arith.constant 8 : index
    %c0_54 = arith.constant 0 : index
    %96 = vector.load %arg2[%c8, %c0_54] : memref<128x128xf32, #tpu.memory_space<vmem>>, vector<2x32xf32>
    %c40 = arith.constant 40 : index
    %c0_55 = arith.constant 0 : index
    %97 = vector.load %arg2[%c40, %c0_55] : memref<128x128xf32, #tpu.memory_space<vmem>>, vector<2x32xf32>
    %c64 = arith.constant 64 : index
    %c0_56 = arith.constant 0 : index
    %98 = vector.load %arg2[%c64, %c0_56] : memref<128x128xf32, #tpu.memory_space<vmem>>, vector<32x32xf32>
    %c96 = arith.constant 96 : index
    %c0_57 = arith.constant 0 : index
    %99 = vector.load %arg2[%c96, %c0_57] : memref<128x128xf32, #tpu.memory_space<vmem>>, vector<32x32xf32>
    %c16 = arith.constant 16 : index
    %c0_58 = arith.constant 0 : index
    %100 = vector.load %arg2[%c16, %c0_58] : memref<128x128xf32, #tpu.memory_space<vmem>>, vector<2x32xf32>
    %c24 = arith.constant 24 : index
    %c0_59 = arith.constant 0 : index
    %101 = vector.load %arg2[%c24, %c0_59] : memref<128x128xf32, #tpu.memory_space<vmem>>, vector<2x32xf32>
    %c32_60 = arith.constant 32 : index
    %c0_61 = arith.constant 0 : index
    %102 = vector.load %arg2[%c32_60, %c0_61] : memref<128x128xf32, #tpu.memory_space<vmem>>, vector<2x32xf32>
    %103 = tpu.iota {dimensions = array<i32: 0>} : vector<2x1xi32>
    %c0_i32_62 = arith.constant 0 : i32
    %104 = vector.broadcast %c0_i32_62 : i32 to vector<2x1xi32>
    %105 = arith.cmpi eq, %103, %104 : vector<2x1xi32>
    %106 = vector.extract_strided_slice %94 {offsets = [0, 0], sizes = [2, 1], strides = [1, 1]} : vector<2x12xf32> to vector<2x1xf32>
    %107 = vector.extract_strided_slice %94 {offsets = [0, 1], sizes = [2, 1], strides = [1, 1]} : vector<2x12xf32> to vector<2x1xf32>
    %108 = vector.extract_strided_slice %94 {offsets = [0, 2], sizes = [2, 1], strides = [1, 1]} : vector<2x12xf32> to vector<2x1xf32>
    %109 = vector.extract_strided_slice %94 {offsets = [0, 3], sizes = [2, 1], strides = [1, 1]} : vector<2x12xf32> to vector<2x1xf32>
    %cst_63 = arith.constant dense<0.000000e+00> : vector<2x32xf32>
    %110 = tpu.matmul %100, %95, %cst_63 {dimension_numbers = #tpu.dot_dimension_numbers<[1], [0], [0], [1], [0, 0, 1, 1], [], []>} : vector<2x32xf32>, vector<32x32xf32>, vector<2x32xf32> -> vector<2x32xf32>
    %cst_64 = arith.constant 0.000000e+00 : f32
    %111 = vector.broadcast %cst_64 : f32 to vector<2x32xf32>
    %112 = arith.cmpf ogt, %100, %111 : vector<2x32xf32>
    %cst_65 = arith.constant 0.000000e+00 : f32
    %113 = vector.broadcast %cst_65 : f32 to vector<2x32xf32>
    %114 = arith.cmpf olt, %100, %113 : vector<2x32xf32>
    %cst_66 = arith.constant -1.000000e+00 : f32
    %cst_67 = arith.constant 0.000000e+00 : f32
    %115 = vector.broadcast %cst_66 : f32 to vector<2x32xf32>
    %116 = vector.broadcast %cst_67 : f32 to vector<2x32xf32>
    %117 = arith.select %114, %115, %116 : vector<2x32xi1>, vector<2x32xf32>
    %cst_68 = arith.constant 1.000000e+00 : f32
    %118 = vector.broadcast %cst_68 : f32 to vector<2x32xf32>
    %119 = arith.select %112, %118, %117 : vector<2x32xi1>, vector<2x32xf32>
    %120 = arith.subf %110, %96 : vector<2x32xf32>
    %121 = vector.broadcast %107 : vector<2x1xf32> to vector<2x32xf32>
    %122 = arith.mulf %119, %121 : vector<2x32xf32>
    %123 = arith.addf %120, %122 : vector<2x32xf32>
    %124 = arith.mulf %101, %97 : vector<2x32xf32>
    %125 = arith.addf %123, %124 : vector<2x32xf32>
    %126 = vector.broadcast %108 : vector<2x1xf32> to vector<2x32xf32>
    %127 = arith.mulf %102, %126 : vector<2x32xf32>
    %128 = arith.addf %125, %127 : vector<2x32xf32>
    %129 = vector.broadcast %106 : vector<2x1xf32> to vector<2x32xf32>
    %130 = arith.mulf %129, %128 : vector<2x32xf32>
    %131 = arith.subf %100, %130 : vector<2x32xf32>
    %cst_69 = arith.constant dense<0.000000e+00> : vector<2x32xf32>
    %132 = tpu.matmul %131, %98, %cst_69 {dimension_numbers = #tpu.dot_dimension_numbers<[1], [0], [0], [1], [0, 0, 1, 1], [], []>} : vector<2x32xf32>, vector<32x32xf32>, vector<2x32xf32> -> vector<2x32xf32>
    %cst_70 = arith.constant dense<0.000000e+00> : vector<2x32xf32>
    %133 = tpu.matmul %131, %99, %cst_70 {dimension_numbers = #tpu.dot_dimension_numbers<[1], [0], [0], [1], [0, 0, 1, 1], [], []>} : vector<2x32xf32>, vector<32x32xf32>, vector<2x32xf32> -> vector<2x32xf32>
    %134 = vector.shape_cast %105 : vector<2x1xi1> to vector<2x1xi1>
    %135 = vector.broadcast %134 : vector<2x1xi1> to vector<2x32xi1>
    %136 = arith.select %135, %132, %133 : vector<2x32xi1>, vector<2x32xf32>
    %cst_71 = arith.constant 2.000000e+00 : f32
    %137 = vector.broadcast %cst_71 : f32 to vector<2x32xf32>
    %138 = arith.mulf %137, %136 : vector<2x32xf32>
    %139 = vector.broadcast %109 : vector<2x1xf32> to vector<2x32xf32>
    %140 = arith.mulf %138, %139 : vector<2x32xf32>
    %141 = arith.addf %101, %140 : vector<2x32xf32>
    %c0_72 = arith.constant 0 : index
    %c0_73 = arith.constant 0 : index
    %c0_74 = arith.constant 0 : index
    %142 = vector.load %arg5[%c0_72, %c0_73, %c0_74] : memref<3x2x32xf32, #tpu.memory_space<vmem>>, vector<1x2x32xf32>
    %143 = vector.shape_cast %142 : vector<1x2x32xf32> to vector<2x32xf32>
    %144 = vector.shape_cast %131 : vector<2x32xf32> to vector<1x2x32xf32>
    tpu.vector_store %arg5[%c0_72, %c0_73, %c0_74], %144 {strides = array<i32>} : memref<3x2x32xf32, #tpu.memory_space<vmem>>, vector<1x2x32xf32>,
    %145 = vector.extract_strided_slice %94 {offsets = [0, 4], sizes = [2, 1], strides = [1, 1]} : vector<2x12xf32> to vector<2x1xf32>
    %146 = vector.extract_strided_slice %94 {offsets = [0, 5], sizes = [2, 1], strides = [1, 1]} : vector<2x12xf32> to vector<2x1xf32>
    %147 = vector.extract_strided_slice %94 {offsets = [0, 6], sizes = [2, 1], strides = [1, 1]} : vector<2x12xf32> to vector<2x1xf32>
    %148 = vector.extract_strided_slice %94 {offsets = [0, 7], sizes = [2, 1], strides = [1, 1]} : vector<2x12xf32> to vector<2x1xf32>
    %cst_75 = arith.constant dense<0.000000e+00> : vector<2x32xf32>
    %149 = tpu.matmul %131, %95, %cst_75 {dimension_numbers = #tpu.dot_dimension_numbers<[1], [0], [0], [1], [0, 0, 1, 1], [], []>} : vector<2x32xf32>, vector<32x32xf32>, vector<2x32xf32> -> vector<2x32xf32>
    %cst_76 = arith.constant 0.000000e+00 : f32
    %150 = vector.broadcast %cst_76 : f32 to vector<2x32xf32>
    %151 = arith.cmpf ogt, %131, %150 : vector<2x32xf32>
    %cst_77 = arith.constant 0.000000e+00 : f32
    %152 = vector.broadcast %cst_77 : f32 to vector<2x32xf32>
    %153 = arith.cmpf olt, %131, %152 : vector<2x32xf32>
    %cst_78 = arith.constant -1.000000e+00 : f32
    %cst_79 = arith.constant 0.000000e+00 : f32
    %154 = vector.broadcast %cst_78 : f32 to vector<2x32xf32>
    %155 = vector.broadcast %cst_79 : f32 to vector<2x32xf32>
    %156 = arith.select %153, %154, %155 : vector<2x32xi1>, vector<2x32xf32>
    %cst_80 = arith.constant 1.000000e+00 : f32
    %157 = vector.broadcast %cst_80 : f32 to vector<2x32xf32>
    %158 = arith.select %151, %157, %156 : vector<2x32xi1>, vector<2x32xf32>
    %159 = arith.subf %149, %96 : vector<2x32xf32>
    %160 = vector.broadcast %146 : vector<2x1xf32> to vector<2x32xf32>
    %161 = arith.mulf %158, %160 : vector<2x32xf32>
    %162 = arith.addf %159, %161 : vector<2x32xf32>
    %163 = arith.mulf %141, %97 : vector<2x32xf32>
    %164 = arith.addf %162, %163 : vector<2x32xf32>
    %165 = vector.broadcast %147 : vector<2x1xf32> to vector<2x32xf32>
    %166 = arith.mulf %138, %165 : vector<2x32xf32>
    %167 = arith.addf %164, %166 : vector<2x32xf32>
    %168 = vector.broadcast %145 : vector<2x1xf32> to vector<2x32xf32>
    %169 = arith.mulf %168, %167 : vector<2x32xf32>
    %170 = arith.subf %131, %169 : vector<2x32xf32>
    %cst_81 = arith.constant dense<0.000000e+00> : vector<2x32xf32>
    %171 = tpu.matmul %170, %98, %cst_81 {dimension_numbers = #tpu.dot_dimension_numbers<[1], [0], [0], [1], [0, 0, 1, 1], [], []>} : vector<2x32xf32>, vector<32x32xf32>, vector<2x32xf32> -> vector<2x32xf32>
    %cst_82 = arith.constant dense<0.000000e+00> : vector<2x32xf32>
    %172 = tpu.matmul %170, %99, %cst_82 {dimension_numbers = #tpu.dot_dimension_numbers<[1], [0], [0], [1], [0, 0, 1, 1], [], []>} : vector<2x32xf32>, vector<32x32xf32>, vector<2x32xf32> -> vector<2x32xf32>
    %173 = vector.shape_cast %105 : vector<2x1xi1> to vector<2x1xi1>
    %174 = vector.broadcast %173 : vector<2x1xi1> to vector<2x32xi1>
    %175 = arith.select %174, %171, %172 : vector<2x32xi1>, vector<2x32xf32>
    %cst_83 = arith.constant 2.000000e+00 : f32
    %176 = vector.broadcast %cst_83 : f32 to vector<2x32xf32>
    %177 = arith.mulf %176, %175 : vector<2x32xf32>
    %178 = vector.broadcast %148 : vector<2x1xf32> to vector<2x32xf32>
    %179 = arith.mulf %177, %178 : vector<2x32xf32>
    %180 = arith.addf %141, %179 : vector<2x32xf32>
    %c1 = arith.constant 1 : index
    %c0_84 = arith.constant 0 : index
    %c0_85 = arith.constant 0 : index
    %181 = vector.load %arg5[%c1, %c0_84, %c0_85] : memref<3x2x32xf32, #tpu.memory_space<vmem>>, vector<1x2x32xf32>
    %182 = vector.shape_cast %181 : vector<1x2x32xf32> to vector<2x32xf32>
    %183 = vector.shape_cast %170 : vector<2x32xf32> to vector<1x2x32xf32>
    tpu.vector_store %arg5[%c1, %c0_84, %c0_85], %183 {strides = array<i32>} : memref<3x2x32xf32, #tpu.memory_space<vmem>>, vector<1x2x32xf32>,
    %184 = vector.extract_strided_slice %94 {offsets = [0, 8], sizes = [2, 1], strides = [1, 1]} : vector<2x12xf32> to vector<2x1xf32>
    %185 = vector.extract_strided_slice %94 {offsets = [0, 9], sizes = [2, 1], strides = [1, 1]} : vector<2x12xf32> to vector<2x1xf32>
    %186 = vector.extract_strided_slice %94 {offsets = [0, 10], sizes = [2, 1], strides = [1, 1]} : vector<2x12xf32> to vector<2x1xf32>
    %cst_86 = arith.constant dense<0.000000e+00> : vector<2x32xf32>
    %187 = tpu.matmul %170, %95, %cst_86 {dimension_numbers = #tpu.dot_dimension_numbers<[1], [0], [0], [1], [0, 0, 1, 1], [], []>} : vector<2x32xf32>, vector<32x32xf32>, vector<2x32xf32> -> vector<2x32xf32>
    %cst_87 = arith.constant 0.000000e+00 : f32
    %188 = vector.broadcast %cst_87 : f32 to vector<2x32xf32>
    %189 = arith.cmpf ogt, %170, %188 : vector<2x32xf32>
    %cst_88 = arith.constant 0.000000e+00 : f32
    %190 = vector.broadcast %cst_88 : f32 to vector<2x32xf32>
    %191 = arith.cmpf olt, %170, %190 : vector<2x32xf32>
    %cst_89 = arith.constant -1.000000e+00 : f32
    %cst_90 = arith.constant 0.000000e+00 : f32
    %192 = vector.broadcast %cst_89 : f32 to vector<2x32xf32>
    %193 = vector.broadcast %cst_90 : f32 to vector<2x32xf32>
    %194 = arith.select %191, %192, %193 : vector<2x32xi1>, vector<2x32xf32>
    %cst_91 = arith.constant 1.000000e+00 : f32
    %195 = vector.broadcast %cst_91 : f32 to vector<2x32xf32>
    %196 = arith.select %189, %195, %194 : vector<2x32xi1>, vector<2x32xf32>
    %197 = arith.subf %187, %96 : vector<2x32xf32>
    %198 = vector.broadcast %185 : vector<2x1xf32> to vector<2x32xf32>
    %199 = arith.mulf %196, %198 : vector<2x32xf32>
    %200 = arith.addf %197, %199 : vector<2x32xf32>
    %201 = arith.mulf %180, %97 : vector<2x32xf32>
    %202 = arith.addf %200, %201 : vector<2x32xf32>
    %203 = vector.broadcast %186 : vector<2x1xf32> to vector<2x32xf32>
    %204 = arith.mulf %177, %203 : vector<2x32xf32>
    %205 = arith.addf %202, %204 : vector<2x32xf32>
    %206 = vector.broadcast %184 : vector<2x1xf32> to vector<2x32xf32>
    %207 = arith.mulf %206, %205 : vector<2x32xf32>
    %208 = arith.subf %170, %207 : vector<2x32xf32>
    %c2_92 = arith.constant 2 : index
    %c0_93 = arith.constant 0 : index
    %c0_94 = arith.constant 0 : index
    %209 = vector.load %arg5[%c2_92, %c0_93, %c0_94] : memref<3x2x32xf32, #tpu.memory_space<vmem>>, vector<1x2x32xf32>
    %210 = vector.shape_cast %209 : vector<1x2x32xf32> to vector<2x32xf32>
    %211 = vector.shape_cast %208 : vector<2x32xf32> to vector<1x2x32xf32>
    tpu.vector_store %arg5[%c2_92, %c0_93, %c0_94], %211 {strides = array<i32>} : memref<3x2x32xf32, #tpu.memory_space<vmem>>, vector<1x2x32xf32>,
    return
  }
}

</mosaic_0001>

<bundles_post_ra>
// kernel: squeeze.6
= control target key start
LH: loop header
LB: loop body
LE: loop exit
PB: predicated region body
PF: predicated region fallthrough
CT: control target
= control target key end

     0   :  { %vm132_vm0 = vcmask 1047556   ;;  %s338_s15 = smov 24   ;;  %s339_s30 = smov 16   ;;  %vm134_vm1 = vcmask 64512   ;;  %vm171_vm2 = vcmask 261312   ;;  %vm214_vm3 = vcmask 195712   ;;  %s535_s0 = inlined_call_operand.vmem [shape: f32[1,4,8,4,8], index: 0, kind: input, shape index: {}]   ;;  %s536_s1 = inlined_call_operand.vmem [shape: f32[32,32], index: 1, kind: output, shape index: {}]  }
   0x1   :  { %v316_v0 = vld [vmem:[%s535_s0 + $0x1c] sm:$0xf]  ;;  %v317_v1 = vld [vmem:[%s535_s0 + $0x18] sm:$0xf]  ;;  %v318_v2 = vld [vmem:[%s535_s0 + $0x14] sm:$0xf] }
   0x2   :  { %103 = vst [vmem:[#allocation0 + $0x38] sm:$0xf] %v316_v0  ;;  %v319_v3 = vld [vmem:[%s535_s0 + $0x10] sm:$0xf]  ;;  %v320_v4 = vld [vmem:[%s535_s0 + $0xc] sm:$0xf] }
   0x3   :  { %107 = vst [vmem:[#allocation0 + $0x30] sm:$0xf] %v317_v1  ;;  %v321_v5 = vld [vmem:[%s535_s0 + $0x8] sm:$0xf]  ;;  %v322_v6 = vld [vmem:[%s535_s0 + $0x4] sm:$0xf] }
   0x4   :  { %111 = vst [vmem:[#allocation0 + $0x28] sm:$0xf] %v318_v2  ;;  %v128_v7 = vld [vmem:[%s535_s0] sm:$0xf]  ;;  %v300_v8 = vld [vmem:[%s535_s0 + $0x5c] sm:$0xf] }
   0x5   :  { %115 = vst [vmem:[#allocation0 + $0x20] sm:$0xf] %v319_v3  ;;  %v301_v9 = vld [vmem:[%s535_s0 + $0x58] sm:$0xf]  ;;  %v302_v10 = vld [vmem:[%s535_s0 + $0x54] sm:$0xf] }
   0x6   :  { %119 = vst [vmem:[#allocation0 + $0x18] sm:$0xf] %v320_v4  ;;  %v303_v11 = vld [vmem:[%s535_s0 + $0x50] sm:$0xf]  ;;  %v304_v12 = vld [vmem:[%s535_s0 + $0x4c] sm:$0xf] }
   0x7   :  { %123 = vst [vmem:[#allocation0 + $0x10] sm:$0xf] %v321_v5  ;;  %v305_v13 = vld [vmem:[%s535_s0 + $0x48] sm:$0xf]  ;;  %v306_v14 = vld [vmem:[%s535_s0 + $0x44] sm:$0xf] }
   0x8   :  { %127 = vst [vmem:[#allocation0 + $0x8] sm:$0xf] %v322_v6  ;;  %v307_v15 = vld [vmem:[%s535_s0 + $0x40] sm:$0xf]  ;;  %v308_v17 = vld [vmem:[%s535_s0 + $0x3c] sm:$0xf] }
   0x9   :  { %129 = vst [vmem:[#allocation0] sm:$0xf] %v128_v7  ;;  %v309_v18 = vld [vmem:[%s535_s0 + $0x38] sm:$0xf]  ;;  %v310_v21 = vld [vmem:[%s535_s0 + $0x34] sm:$0xf] }
   0xa   :  { %39 = vst [vmem:[#allocation0 + $0xb8] sm:$0xf] %v300_v8  ;;  %v311_v22 = vld [vmem:[%s535_s0 + $0x30] sm:$0xf]  ;;  %v312_v23 = vld [vmem:[%s535_s0 + $0x2c] sm:$0xf] }
   0xb   :  { %43 = vst [vmem:[#allocation0 + $0xb0] sm:$0xf] %v301_v9  ;;  %v313_v24 = vld [vmem:[%s535_s0 + $0x28] sm:$0xf]  ;;  %v314_v25 = vld [vmem:[%s535_s0 + $0x24] sm:$0xf] }
   0xc   :  { %47 = vst [vmem:[#allocation0 + $0xa8] sm:$0xf] %v302_v10  ;;  %v166_v16 = vld [vmem:[#allocation0 + $0x3] ss:$8 sm:$0xf0]   ;;  %vm257_vm4 = vcmask 130112  }
   0xd   :  { %51 = vst [vmem:[#allocation0 + $0xa0] sm:$0xf] %v303_v11  ;;  %v315_v26 = vld [vmem:[%s535_s0 + $0x20] sm:$0xf]  ;;  %v292_v30 = vld [vmem:[%s535_s0 + $0x7c] sm:$0xf] }
   0xe   :  { %55 = vst [vmem:[#allocation0 + $0x98] sm:$0xf] %v304_v12  ;;  %v209_v29 = vld [vmem:[#allocation0 + $0x2] ss:$8 sm:$0xf0]  }
   0xf   :  { %59 = vst [vmem:[#allocation0 + $0x90] sm:$0xf] %v305_v13  ;;  %v293_v31 = vld [vmem:[%s535_s0 + $0x78] sm:$0xf]  ;;  %v294_v35 = vld [vmem:[%s535_s0 + $0x74] sm:$0xf] }
  0x10   :  { %v164_v19 = vld [vmem:[#allocation0 + $0x3] ss:$8 sm:$0xf]   ;;  %63 = vst [vmem:[#allocation0 + $0x88] sm:$0xf] %v306_v14 }
  0x11   :  { %v168_v20 = vsel %vm132_vm0, %v166_v16, %v164_v19  ;;  %67 = vst [vmem:[#allocation0 + $0x80] sm:$0xf] %v307_v15  ;;  %v207_v27 = vld [vmem:[#allocation0 + $0x2] ss:$8 sm:$0xf]  }
  0x12   :  { %169 = vrot.lane.b32.xlu0 %v168_v20, %s338_s15  ;;  %71 = vst [vmem:[#allocation0 + $0x78] sm:$0xf] %v308_v17  ;;  %v211_v32 = vsel %vm132_vm0, %v209_v29, %v207_v27  ;;  %v295_v36 = vld [vmem:[%s535_s0 + $0x70] sm:$0xf]  ;;  %v296_v37 = vld [vmem:[%s535_s0 + $0x6c] sm:$0xf] }
  0x13   :  { %75 = vst [vmem:[#allocation0 + $0x70] sm:$0xf] %v309_v18  ;;  %212 = vrot.lane.b32.xlu2 %v211_v32, %s339_s30  ;;  %v297_v38 = vld [vmem:[%s535_s0 + $0x68] sm:$0xf]  ;;  %v298_v39 = vld [vmem:[%s535_s0 + $0x64] sm:$0xf] }
  0x14   :  { %79 = vst [vmem:[#allocation0 + $0x68] sm:$0xf] %v310_v21  ;;  %v187_v28 = vld [vmem:[#allocation0 + $0x83] ss:$8 sm:$0xf0]  }
  0x15   :  { %83 = vst [vmem:[#allocation0 + $0x60] sm:$0xf] %v311_v22  ;;  %v299_v40 = vld [vmem:[%s535_s0 + $0x60] sm:$0xf]  ;;  %s340_s0 = smov 8  }
  0x16   :  { %87 = vst [vmem:[#allocation0 + $0x58] sm:$0xf] %v312_v23  ;;  %v230_v48 = vld [vmem:[#allocation0 + $0x82] ss:$8 sm:$0xf0]  }
  0x17   :  { %91 = vst [vmem:[#allocation0 + $0x50] sm:$0xf] %v313_v24  ;;  %v250_v49 = vld [vmem:[#allocation0 + $0x1] ss:$8 sm:$0xf]  }
  0x18   :  { %v185_v33 = vld [vmem:[#allocation0 + $0x83] ss:$8 sm:$0xf]   ;;  %95 = vst [vmem:[#allocation0 + $0x48] sm:$0xf] %v314_v25 }
  0x19   :  { %v189_v34 = vsel %vm132_vm0, %v187_v28, %v185_v33  ;;  %99 = vst [vmem:[#allocation0 + $0x40] sm:$0xf] %v315_v26  ;;  %v228_v47 = vld [vmem:[#allocation0 + $0x82] ss:$8 sm:$0xf]  }
  0x1a   :  { %190 = vrot.lane.b32.xlu1 %v189_v34, %s338_s15  ;;  %7 = vst [vmem:[#allocation0 + $0xf8] sm:$0xf] %v292_v30  ;;  %v252_v51 = vld [vmem:[#allocation0 + $0x1] ss:$8 sm:$0xf0]   ;;  %v232_v52 = vsel %vm132_vm0, %v230_v48, %v228_v47 }
  0x1b   :  { %11 = vst [vmem:[#allocation0 + $0xf0] sm:$0xf] %v293_v31  ;;  %v254_v55 = vsel %vm132_vm0, %v252_v51, %v250_v49  ;;  %v271_v1 = vld [vmem:[#allocation0 + $0x81] ss:$8 sm:$0xf]  }
  0x1c   :  { %15 = vst [vmem:[#allocation0 + $0xe8] sm:$0xf] %v294_v35  ;;  %v176_v41 = vld [vmem:[#allocation0 + $0x43] ss:$8 sm:$0xf0]  }
  0x1d   :  { %19 = vst [vmem:[#allocation0 + $0xe0] sm:$0xf] %v295_v36  ;;  %v219_v42 = vld [vmem:[#allocation0 + $0x42] ss:$8 sm:$0xf0]  }
  0x1e   :  { %23 = vst [vmem:[#allocation0 + $0xd8] sm:$0xf] %v296_v37  ;;  %v262_v57 = vld [vmem:[#allocation0 + $0x41] ss:$8 sm:$0xf0]  }
  0x1f   :  { %27 = vst [vmem:[#allocation0 + $0xd0] sm:$0xf] %v297_v38  ;;  %v273_v2 = vld [vmem:[#allocation0 + $0x81] ss:$8 sm:$0xf0]  }
  0x20   :  { %v174_v43 = vld [vmem:[#allocation0 + $0x43] ss:$8 sm:$0xf]   ;;  %31 = vst [vmem:[#allocation0 + $0xc8] sm:$0xf] %v298_v39  ;;  %v275_v3 = vsel %vm132_vm0, %v273_v2, %v271_v1 }
  0x21   :  { %v178_v44 = vsel %vm132_vm0, %v176_v41, %v174_v43  ;;  %35 = vst [vmem:[#allocation0 + $0xc0] sm:$0xf] %v299_v40  ;;  %v217_v45 = vld [vmem:[#allocation0 + $0x42] ss:$8 sm:$0xf]  }
  0x22   :  { %179 = vrot.lane.b32.xlu0 %v178_v44, %s338_s15  ;;  %v221_v46 = vsel %vm132_vm0, %v219_v42, %v217_v45  ;;  %v260_v56 = vld [vmem:[#allocation0 + $0x41] ss:$8 sm:$0xf]   ;;  %v130_v4 = vld [vmem:[#allocation0] ss:$8 sm:$0xf]  }
  0x23   :  { %222 = vrot.lane.b32.xlu2 %v221_v46, %s339_s30  ;;  %v264_v63 = vsel %vm132_vm0, %v262_v57, %v260_v56  ;;  %v131_v5 = vld [vmem:[#allocation0] ss:$8 sm:$0xf0]  }
  0x24   :  { %v198_v50 = vld [vmem:[#allocation0 + $0xc3] ss:$8 sm:$0xf0]   ;;  %v241_v59 = vld [vmem:[#allocation0 + $0xc2] ss:$8 sm:$0xf0]   ;;  %v133_v6 = vsel %vm132_vm0, %v131_v5, %v130_v4 }
  0x25   :  { %v284_v61 = vld [vmem:[#allocation0 + $0xc1] ss:$8 sm:$0xf0]   ;;  %135 = vst.msk [vmem:[%s536_s1] sm:$0xff] %vm134_vm1, %v133_v6  }
  0x26   :  { %v146_v7 = vld [vmem:[#allocation0 + $0x80] ss:$8 sm:$0xf]  }
  0x27   :  { %v148_v8 = vld [vmem:[#allocation0 + $0x80] ss:$8 sm:$0xf0]  }
  0x28   :  { %v196_v53 = vld [vmem:[#allocation0 + $0xc3] ss:$8 sm:$0xf]   ;;  %v239_v58 = vld [vmem:[#allocation0 + $0xc2] ss:$8 sm:$0xf]   ;;  %v150_v9 = vsel %vm132_vm0, %v148_v8, %v146_v7 }
  0x29   :  { %v200_v54 = vsel %vm132_vm0, %v198_v50, %v196_v53  ;;  %v282_v60 = vld [vmem:[#allocation0 + $0xc1] ss:$8 sm:$0xf]   ;;  %v243_v62 = vsel %vm132_vm0, %v241_v59, %v239_v58  ;;  %324 = vst.msk [vmem:[%s536_s1 + $0x10] sm:$0xff] %vm134_vm1, %v150_v9  }
  0x2a   :  { %201 = vrot.lane.b32.xlu1 %v200_v54, %s338_s15  ;;  %233 = vrot.lane.b32.xlu0 %v232_v52, %s339_s30  ;;  %v286_v0 = vsel %vm132_vm0, %v284_v61, %v282_v60  ;;  %v137_v11 = vld [vmem:[#allocation0 + $0x40] ss:$8 sm:$0xf]  }
  0x2b   :  { %255 = vrot.lane.b32.xlu2 %v254_v55, %s340_s0  ;;  %v139_v12 = vld [vmem:[#allocation0 + $0x40] ss:$8 sm:$0xf0]  }
  0x2c   :  { %v141_v13 = vsel %vm132_vm0, %v139_v12, %v137_v11  ;;  %v155_v14 = vld [vmem:[#allocation0 + $0xc0] ss:$8 sm:$0xf]  }
  0x2d   :  { %323 = vst.msk [vmem:[%s536_s1 + $0x8] sm:$0xff] %vm134_vm1, %v141_v13   ;;  %v157_v15 = vld [vmem:[#allocation0 + $0xc0] ss:$8 sm:$0xf0]  }
  0x2e   :  { %v159_v16 = vsel %vm132_vm0, %v157_v15, %v155_v14 }
  0x2f   :  { %325 = vst.msk [vmem:[%s536_s1 + $0x18] sm:$0xff] %vm134_vm1, %v159_v16  }
  0x32   :  { %244 = vrot.lane.b32.xlu1 %v243_v62, %s339_s30  ;;  %265 = vrot.lane.b32.xlu0 %v264_v63, %s340_s0 }
  0x33   :  { %287 = vrot.lane.b32.xlu2 %v286_v0, %s340_s0 }
  0x3a   :  { %276 = vrot.lane.b32.xlu1 %v275_v3, %s340_s0 }
  0x6d   :  { %v213_v10 = vpop.permute.xlu2 %212  }
  0x7d   :  { %v223_v17 = vpop.permute.xlu2 %222  }
  0x84   :  { %v170_v18 = vpop.permute.xlu0 %169  }
  0x85   :  { %172 = vst.msk [vmem:[%s536_s1] sm:$0xff] %vm171_vm2, %v170_v18   ;;  %v256_v19 = vpop.permute.xlu2 %255  }
  0x86   :  { %215 = vst.msk [vmem:[%s536_s1] sm:$0xff] %vm214_vm3, %v213_v10  }
  0x87   :  { %258 = vst.msk [vmem:[%s536_s1] sm:$0xff] %vm257_vm4, %v256_v19  }
  0x8c   :  { %v191_v20 = vpop.permute.xlu1 %190  }
  0x8d   :  { %327 = vst.msk [vmem:[%s536_s1 + $0x10] sm:$0xff] %vm171_vm2, %v191_v20   ;;  %v288_v21 = vpop.permute.xlu2 %287  }
  0x94   :  { %v180_v22 = vpop.permute.xlu0 %179  }
  0x95   :  { %326 = vst.msk [vmem:[%s536_s1 + $0x8] sm:$0xff] %vm171_vm2, %v180_v22  }
  0x96   :  { %329 = vst.msk [vmem:[%s536_s1 + $0x8] sm:$0xff] %vm214_vm3, %v223_v17  }
  0x9c   :  { %v202_v23 = vpop.permute.xlu1 %201   ;;  %v234_v24 = vpop.permute.xlu0 %233  }
  0x9d   :  { %328 = vst.msk [vmem:[%s536_s1 + $0x18] sm:$0xff] %vm171_vm2, %v202_v23  }
  0x9e   :  { %330 = vst.msk [vmem:[%s536_s1 + $0x10] sm:$0xff] %vm214_vm3, %v234_v24  }
  0xa4   :  { %v245_v25 = vpop.permute.xlu1 %244   ;;  %v266_v26 = vpop.permute.xlu0 %265  }
  0xa5   :  { %331 = vst.msk [vmem:[%s536_s1 + $0x18] sm:$0xff] %vm214_vm3, %v245_v25  }
  0xa6   :  { %332 = vst.msk [vmem:[%s536_s1 + $0x8] sm:$0xff] %vm257_vm4, %v266_v26  }
  0xa7   :  { %334 = vst.msk [vmem:[%s536_s1 + $0x18] sm:$0xff] %vm257_vm4, %v288_v21  }
  0xac   :  { %v277_v27 = vpop.permute.xlu1 %276  }
  0xad   :  { %333 = vst.msk [vmem:[%s536_s1 + $0x10] sm:$0xff] %vm257_vm4, %v277_v27  }

// kernel: forward.1
= control target key start
LH: loop header
LB: loop body
LE: loop exit
PB: predicated region body
PF: predicated region fallthrough
CT: control target
= control target key end

     0   :  { %s2444_s0 = inlined_call_operand.vmem [shape: f32[352,128], index: 0, kind: input, shape index: {}]   ;;  %s2445_s1 = inlined_call_operand.vmem [shape: f32[1,1536], index: 1, kind: input, shape index: {}]   ;;  %s2446_s2 = inlined_call_operand.vmem [shape: f32[128,128], index: 2, kind: input, shape index: {}]   ;;  %s2447_s3 = inlined_call_operand.vmem [shape: bf16[128,256], index: 3, kind: input, shape index: {}]   ;;  %s2448_s4 = inlined_call_operand.vmem [shape: bf16[256,512], index: 4, kind: input, shape index: {}]   ;;  %s2449_s5 = inlined_call_operand.vmem [shape: f32[3,2,32], index: 5, kind: output, shape index: {}]  }
   0x1   :  { %v26_v0 = vld [vmem:[%s2447_s3] sm:$0xff]  ;;  %v28_v1 = vld [vmem:[%s2447_s3 + $0x8] sm:$0xff]  ;;  %v30_v2 = vld [vmem:[%s2447_s3 + $0x10] sm:$0xff] }
   0x2   :  { %27 = vst [vmem:[#allocation2] sm:$0xff] %v26_v0  ;;  %v32_v3 = vld [vmem:[%s2447_s3 + $0x18] sm:$0xff]  ;;  %v34_v4 = vld [vmem:[%s2447_s3 + $0x20] sm:$0xff]  ;;  %v36_v5 = vld [vmem:[%s2447_s3 + $0x28] sm:$0xff] }
   0x3   :  { %29 = vst [vmem:[#allocation2 + $0x8] sm:$0xff] %v28_v1  ;;  %v38_v6 = vld [vmem:[%s2447_s3 + $0x30] sm:$0xff]  ;;  %v40_v7 = vld [vmem:[%s2447_s3 + $0x38] sm:$0xff]  ;;  %v42_v8 = vld [vmem:[%s2447_s3 + $0x40] sm:$0xff] }
   0x4   :  { %31 = vst [vmem:[#allocation2 + $0x10] sm:$0xff] %v30_v2  ;;  %v44_v9 = vld [vmem:[%s2447_s3 + $0x48] sm:$0xff]  ;;  %v46_v10 = vld [vmem:[%s2447_s3 + $0x50] sm:$0xff]  ;;  %v48_v11 = vld [vmem:[%s2447_s3 + $0x58] sm:$0xff] }
   0x5   :  { %33 = vst [vmem:[#allocation2 + $0x18] sm:$0xff] %v32_v3  ;;  %v50_v12 = vld [vmem:[%s2447_s3 + $0x60] sm:$0xff]  ;;  %v52_v13 = vld [vmem:[%s2447_s3 + $0x68] sm:$0xff]  ;;  %v54_v14 = vld [vmem:[%s2447_s3 + $0x70] sm:$0xff] }
   0x6   :  { %35 = vst [vmem:[#allocation2 + $0x20] sm:$0xff] %v34_v4  ;;  %v56_v15 = vld [vmem:[%s2447_s3 + $0x78] sm:$0xff] }
   0x7   :  { %37 = vst [vmem:[#allocation2 + $0x28] sm:$0xff] %v36_v5 }
   0x8   :  { %39 = vst [vmem:[#allocation2 + $0x30] sm:$0xff] %v38_v6 }
   0x9   :  { %41 = vst [vmem:[#allocation2 + $0x38] sm:$0xff] %v40_v7 }
   0xa   :  { %43 = vst [vmem:[#allocation2 + $0x40] sm:$0xff] %v42_v8 }
   0xb   :  { %45 = vst [vmem:[#allocation2 + $0x48] sm:$0xff] %v44_v9 }
   0xc   :  { %47 = vst [vmem:[#allocation2 + $0x50] sm:$0xff] %v46_v10 }
   0xd   :  { %49 = vst [vmem:[#allocation2 + $0x58] sm:$0xff] %v48_v11 }
   0xe   :  { %51 = vst [vmem:[#allocation2 + $0x60] sm:$0xff] %v50_v12 }
   0xf   :  { %53 = vst [vmem:[#allocation2 + $0x68] sm:$0xff] %v52_v13 }
  0x10   :  { %55 = vst [vmem:[#allocation2 + $0x70] sm:$0xff] %v54_v14 }
  0x11   :  { %57 = vst [vmem:[#allocation2 + $0x78] sm:$0xff] %v56_v15 }
  0x12   :  { %63 = vsyncadd [#allocation5], 2048  ;;  %v75_v16 = vld [vmem:[%s2448_s4] sm:$0xff]  ;;  %v77_v17 = vld [vmem:[%s2448_s4 + $0x8] sm:$0xff] }
  0x13   :  { %76 = vst [vmem:[#allocation3] sm:$0xff] %v75_v16  ;;  %v79_v18 = vld [vmem:[%s2448_s4 + $0x10] sm:$0xff]  ;;  %v81_v19 = vld [vmem:[%s2448_s4 + $0x18] sm:$0xff]  ;;  %v83_v20 = vld [vmem:[%s2448_s4 + $0x20] sm:$0xff] }
  0x14   :  { %78 = vst [vmem:[#allocation3 + $0x8] sm:$0xff] %v77_v17  ;;  %v85_v21 = vld [vmem:[%s2448_s4 + $0x28] sm:$0xff]  ;;  %v87_v22 = vld [vmem:[%s2448_s4 + $0x30] sm:$0xff]  ;;  %v89_v23 = vld [vmem:[%s2448_s4 + $0x38] sm:$0xff] }
  0x15   :  { %80 = vst [vmem:[#allocation3 + $0x10] sm:$0xff] %v79_v18  ;;  %v91_v24 = vld [vmem:[%s2448_s4 + $0x40] sm:$0xff]  ;;  %v93_v25 = vld [vmem:[%s2448_s4 + $0x48] sm:$0xff]  ;;  %v95_v26 = vld [vmem:[%s2448_s4 + $0x50] sm:$0xff] }
  0x16   :  { %82 = vst [vmem:[#allocation3 + $0x18] sm:$0xff] %v81_v19  ;;  %v97_v27 = vld [vmem:[%s2448_s4 + $0x58] sm:$0xff]  ;;  %v99_v28 = vld [vmem:[%s2448_s4 + $0x60] sm:$0xff]  ;;  %v101_v29 = vld [vmem:[%s2448_s4 + $0x68] sm:$0xff] }
  0x17   :  { %84 = vst [vmem:[#allocation3 + $0x20] sm:$0xff] %v83_v20  ;;  %v103_v30 = vld [vmem:[%s2448_s4 + $0x70] sm:$0xff]  ;;  %v105_v31 = vld [vmem:[%s2448_s4 + $0x78] sm:$0xff]  ;;  %v107_v32 = vld [vmem:[%s2448_s4 + $0x80] sm:$0xff] }
  0x18   :  { %86 = vst [vmem:[#allocation3 + $0x28] sm:$0xff] %v85_v21  ;;  %v109_v33 = vld [vmem:[%s2448_s4 + $0x88] sm:$0xff]  ;;  %v111_v34 = vld [vmem:[%s2448_s4 + $0x90] sm:$0xff]  ;;  %v113_v35 = vld [vmem:[%s2448_s4 + $0x98] sm:$0xff] }
  0x19   :  { %88 = vst [vmem:[#allocation3 + $0x30] sm:$0xff] %v87_v22  ;;  %v115_v36 = vld [vmem:[%s2448_s4 + $0xa0] sm:$0xff]  ;;  %v117_v37 = vld [vmem:[%s2448_s4 + $0xa8] sm:$0xff]  ;;  %v119_v38 = vld [vmem:[%s2448_s4 + $0xb0] sm:$0xff] }
  0x1a   :  { %90 = vst [vmem:[#allocation3 + $0x38] sm:$0xff] %v89_v23  ;;  %v121_v39 = vld [vmem:[%s2448_s4 + $0xb8] sm:$0xff]  ;;  %v123_v40 = vld [vmem:[%s2448_s4 + $0xc0] sm:$0xff]  ;;  %v125_v41 = vld [vmem:[%s2448_s4 + $0xc8] sm:$0xff] }
  0x1b   :  { %92 = vst [vmem:[#allocation3 + $0x40] sm:$0xff] %v91_v24  ;;  %v127_v42 = vld [vmem:[%s2448_s4 + $0xd0] sm:$0xff]  ;;  %v129_v43 = vld [vmem:[%s2448_s4 + $0xd8] sm:$0xff]  ;;  %v131_v44 = vld [vmem:[%s2448_s4 + $0xe0] sm:$0xff] }
  0x1c   :  { %94 = vst [vmem:[#allocation3 + $0x48] sm:$0xff] %v93_v25  ;;  %v133_v45 = vld [vmem:[%s2448_s4 + $0xe8] sm:$0xff]  ;;  %v135_v46 = vld [vmem:[%s2448_s4 + $0xf0] sm:$0xff]  ;;  %v137_v47 = vld [vmem:[%s2448_s4 + $0xf8] sm:$0xff] }
  0x1d   :  { %96 = vst [vmem:[#allocation3 + $0x50] sm:$0xff] %v95_v26  ;;  %v139_v48 = vld [vmem:[%s2448_s4 + $0x100] sm:$0xff]  ;;  %v141_v49 = vld [vmem:[%s2448_s4 + $0x108] sm:$0xff]  ;;  %v143_v50 = vld [vmem:[%s2448_s4 + $0x110] sm:$0xff] }
  0x1e   :  { %98 = vst [vmem:[#allocation3 + $0x58] sm:$0xff] %v97_v27  ;;  %v145_v51 = vld [vmem:[%s2448_s4 + $0x118] sm:$0xff]  ;;  %v147_v52 = vld [vmem:[%s2448_s4 + $0x120] sm:$0xff]  ;;  %v149_v53 = vld [vmem:[%s2448_s4 + $0x128] sm:$0xff] }
  0x1f   :  { %100 = vst [vmem:[#allocation3 + $0x60] sm:$0xff] %v99_v28  ;;  %v151_v54 = vld [vmem:[%s2448_s4 + $0x130] sm:$0xff]  ;;  %v153_v55 = vld [vmem:[%s2448_s4 + $0x138] sm:$0xff]  ;;  %v155_v56 = vld [vmem:[%s2448_s4 + $0x140] sm:$0xff] }
  0x20   :  { %102 = vst [vmem:[#allocation3 + $0x68] sm:$0xff] %v101_v29  ;;  %v157_v57 = vld [vmem:[%s2448_s4 + $0x148] sm:$0xff]  ;;  %v159_v58 = vld [vmem:[%s2448_s4 + $0x150] sm:$0xff]  ;;  %v161_v59 = vld [vmem:[%s2448_s4 + $0x158] sm:$0xff] }
  0x21   :  { %104 = vst [vmem:[#allocation3 + $0x70] sm:$0xff] %v103_v30  ;;  %v163_v60 = vld [vmem:[%s2448_s4 + $0x160] sm:$0xff]  ;;  %v165_v61 = vld [vmem:[%s2448_s4 + $0x168] sm:$0xff]  ;;  %v167_v62 = vld [vmem:[%s2448_s4 + $0x170] sm:$0xff] }
  0x22   :  { %106 = vst [vmem:[#allocation3 + $0x78] sm:$0xff] %v105_v31  ;;  %v169_v63 = vld [vmem:[%s2448_s4 + $0x178] sm:$0xff]  ;;  %v171_v0 = vld [vmem:[%s2448_s4 + $0x180] sm:$0xff]  ;;  %v173_v1 = vld [vmem:[%s2448_s4 + $0x188] sm:$0xff] }
  0x23   :  { %108 = vst [vmem:[#allocation3 + $0x80] sm:$0xff] %v107_v32  ;;  %v175_v2 = vld [vmem:[%s2448_s4 + $0x190] sm:$0xff]  ;;  %v177_v3 = vld [vmem:[%s2448_s4 + $0x198] sm:$0xff]  ;;  %v179_v4 = vld [vmem:[%s2448_s4 + $0x1a0] sm:$0xff] }
  0x24   :  { %110 = vst [vmem:[#allocation3 + $0x88] sm:$0xff] %v109_v33  ;;  %v181_v5 = vld [vmem:[%s2448_s4 + $0x1a8] sm:$0xff]  ;;  %v183_v6 = vld [vmem:[%s2448_s4 + $0x1b0] sm:$0xff]  ;;  %v185_v7 = vld [vmem:[%s2448_s4 + $0x1b8] sm:$0xff] }
  0x25   :  { %112 = vst [vmem:[#allocation3 + $0x90] sm:$0xff] %v111_v34  ;;  %v187_v8 = vld [vmem:[%s2448_s4 + $0x1c0] sm:$0xff]  ;;  %v189_v9 = vld [vmem:[%s2448_s4 + $0x1c8] sm:$0xff]  ;;  %v191_v10 = vld [vmem:[%s2448_s4 + $0x1d0] sm:$0xff] }
  0x26   :  { %114 = vst [vmem:[#allocation3 + $0x98] sm:$0xff] %v113_v35  ;;  %v193_v11 = vld [vmem:[%s2448_s4 + $0x1d8] sm:$0xff]  ;;  %v195_v12 = vld [vmem:[%s2448_s4 + $0x1e0] sm:$0xff]  ;;  %v197_v13 = vld [vmem:[%s2448_s4 + $0x1e8] sm:$0xff] }
  0x27   :  { %116 = vst [vmem:[#allocation3 + $0xa0] sm:$0xff] %v115_v36  ;;  %v199_v14 = vld [vmem:[%s2448_s4 + $0x1f0] sm:$0xff]  ;;  %v201_v15 = vld [vmem:[%s2448_s4 + $0x1f8] sm:$0xff] }
  0x28   :  { %118 = vst [vmem:[#allocation3 + $0xa8] sm:$0xff] %v117_v37 }
  0x29   :  { %120 = vst [vmem:[#allocation3 + $0xb0] sm:$0xff] %v119_v38 }
  0x2a   :  { %122 = vst [vmem:[#allocation3 + $0xb8] sm:$0xff] %v121_v39 }
  0x2b   :  { %124 = vst [vmem:[#allocation3 + $0xc0] sm:$0xff] %v123_v40 }
  0x2c   :  { %126 = vst [vmem:[#allocation3 + $0xc8] sm:$0xff] %v125_v41 }
  0x2d   :  { %128 = vst [vmem:[#allocation3 + $0xd0] sm:$0xff] %v127_v42 }
  0x2e   :  { %130 = vst [vmem:[#allocation3 + $0xd8] sm:$0xff] %v129_v43 }
  0x2f   :  { %132 = vst [vmem:[#allocation3 + $0xe0] sm:$0xff] %v131_v44 }
  0x30   :  { %134 = vst [vmem:[#allocation3 + $0xe8] sm:$0xff] %v133_v45 }
  0x31   :  { %136 = vst [vmem:[#allocation3 + $0xf0] sm:$0xff] %v135_v46 }
  0x32   :  { %138 = vst [vmem:[#allocation3 + $0xf8] sm:$0xff] %v137_v47 }
  0x33   :  { %140 = vst [vmem:[#allocation3 + $0x100] sm:$0xff] %v139_v48 }
  0x34   :  { %142 = vst [vmem:[#allocation3 + $0x108] sm:$0xff] %v141_v49 }
  0x35   :  { %144 = vst [vmem:[#allocation3 + $0x110] sm:$0xff] %v143_v50 }
  0x36   :  { %146 = vst [vmem:[#allocation3 + $0x118] sm:$0xff] %v145_v51 }
  0x37   :  { %148 = vst [vmem:[#allocation3 + $0x120] sm:$0xff] %v147_v52 }
  0x38   :  { %150 = vst [vmem:[#allocation3 + $0x128] sm:$0xff] %v149_v53 }
  0x39   :  { %152 = vst [vmem:[#allocation3 + $0x130] sm:$0xff] %v151_v54 }
  0x3a   :  { %154 = vst [vmem:[#allocation3 + $0x138] sm:$0xff] %v153_v55 }
  0x3b   :  { %156 = vst [vmem:[#allocation3 + $0x140] sm:$0xff] %v155_v56 }
  0x3c   :  { %158 = vst [vmem:[#allocation3 + $0x148] sm:$0xff] %v157_v57 }
  0x3d   :  { %160 = vst [vmem:[#allocation3 + $0x150] sm:$0xff] %v159_v58 }
  0x3e   :  { %162 = vst [vmem:[#allocation3 + $0x158] sm:$0xff] %v161_v59 }
  0x3f   :  { %164 = vst [vmem:[#allocation3 + $0x160] sm:$0xff] %v163_v60 }
  0x40   :  { %166 = vst [vmem:[#allocation3 + $0x168] sm:$0xff] %v165_v61 }
  0x41   :  { %168 = vst [vmem:[#allocation3 + $0x170] sm:$0xff] %v167_v62 }
  0x42   :  { %170 = vst [vmem:[#allocation3 + $0x178] sm:$0xff] %v169_v63 }
  0x43   :  { %172 = vst [vmem:[#allocation3 + $0x180] sm:$0xff] %v171_v0 }
  0x44   :  { %174 = vst [vmem:[#allocation3 + $0x188] sm:$0xff] %v173_v1 }
  0x45   :  { %176 = vst [vmem:[#allocation3 + $0x190] sm:$0xff] %v175_v2 }
  0x46   :  { %178 = vst [vmem:[#allocation3 + $0x198] sm:$0xff] %v177_v3 }
  0x47   :  { %180 = vst [vmem:[#allocation3 + $0x1a0] sm:$0xff] %v179_v4 }
  0x48   :  { %182 = vst [vmem:[#allocation3 + $0x1a8] sm:$0xff] %v181_v5 }
  0x49   :  { %184 = vst [vmem:[#allocation3 + $0x1b0] sm:$0xff] %v183_v6 }
  0x4a   :  { %186 = vst [vmem:[#allocation3 + $0x1b8] sm:$0xff] %v185_v7 }
  0x4b   :  { %188 = vst [vmem:[#allocation3 + $0x1c0] sm:$0xff] %v187_v8 }
  0x4c   :  { %190 = vst [vmem:[#allocation3 + $0x1c8] sm:$0xff] %v189_v9 }
  0x4d   :  { %192 = vst [vmem:[#allocation3 + $0x1d0] sm:$0xff] %v191_v10 }
  0x4e   :  { %194 = vst [vmem:[#allocation3 + $0x1d8] sm:$0xff] %v193_v11 }
  0x4f   :  { %196 = vst [vmem:[#allocation3 + $0x1e0] sm:$0xff] %v195_v12 }
  0x50   :  { %198 = vst [vmem:[#allocation3 + $0x1e8] sm:$0xff] %v197_v13 }
  0x51   :  { %200 = vst [vmem:[#allocation3 + $0x1f0] sm:$0xff] %v199_v14 }
  0x52   :  { %202 = vst [vmem:[#allocation3 + $0x1f8] sm:$0xff] %v201_v15 }
  0x53   :  { %208 = vsyncadd [#allocation5 + $0x1], 8192  ;;  %v213_v16 = vld [vmem:[%s2444_s0 + $0x18] sm:$0xff]  ;;  %v212_v17 = vld [vmem:[%s2444_s0 + $0x10] sm:$0xff]  ;;  %vm218_vm0 = vcmask 261120  }
  0x54   :  { %234 = vmatpush.msra.mxu0 %v213_v16  ;;  %v211_v18 = vld [vmem:[%s2444_s0 + $0x8] sm:$0xff]  ;;  %v210_v19 = vld [vmem:[%s2444_s0] sm:$0xff] }
  0x55   :  { %v209_v20 = vld [vmem:[%s2446_s2] sm:$0x3] }
  0x56   :  { %235 = vmatpush.msra.mxu0 %v212_v17  ;;  %v1846_v21 = vld [vmem:[%s2445_s1] ss:$0 sm:$0xff] }
  0x58   :  { %236 = vmatpush.msra.mxu0 %v211_v18 }
  0x5a   :  { %237 = vmatpush.msra.mxu0 %v210_v19 }
  0x5b   :  { %1416 = vmatmul.msk.f32.vlgmr.msra.gmra.mxu0 %vm218_vm0, %v209_v20 }
  0xd8   :  { %v239_v22 = vpop.f32.mrf.mxu0 }
  0xd9   :  { %v240_v23 = vadd.f32 %v1846_v21, %v239_v22 }
  0xdb   :  { %vm242_vm1 = vcmp.ge.f32.partialorder %v240_v23, 0.0  ;;  %v243_v24 = vmul.f32 0.01, %v240_v23 }
  0xdd   :  { %v2171_v25 = vsel %vm242_vm1, %v240_v23, %v243_v24 }
  0xde   :  { %1866 = dma.done.wait [#allocation5], 2048 }
  0xdf   :  { %1867 = vsyncadd [#allocation5], 4294965248  ;;  %v1475_v26 = vld [vmem:[#allocation2 + $0x70] sm:$0xf]  ;;  %v1769_v27 = vld [vmem:[#allocation2 + $0x74] sm:$0xf0]  ;;  %v250_v10 = vpack.c.bf16 %v2171_v25, %v2171_v25 }
  0xe0   :  { %v1768_v28 = vld [vmem:[#allocation2 + $0x74] sm:$0xf]  ;;  %v1476_v29 = vor.u32 %v1769_v27, %v1475_v26  ;;  %v1477_v30 = vld [vmem:[#allocation2 + $0x78] sm:$0xf0]  ;;  %v1467_v31 = vld [vmem:[#allocation2 + $0x60] sm:$0xf] }
  0xe1   :  { %v1767_v32 = vld [vmem:[#allocation2 + $0x64] sm:$0xf0]  ;;  %v1480_v33 = vor.u32 %v1768_v28, %v1477_v30  ;;  %v1766_v34 = vld [vmem:[#allocation2 + $0x64] sm:$0xf]  ;;  %v1469_v35 = vld [vmem:[#allocation2 + $0x68] sm:$0xf0] }
  0xe2   :  { %352 = vmatpush.bf16.msra.mxu1 %v1476_v29  ;;  %v1468_v36 = vor.u32 %v1767_v32, %v1467_v31  ;;  %v1472_v37 = vor.u32 %v1766_v34, %v1469_v35  ;;  %v1459_v38 = vld [vmem:[#allocation2 + $0x50] sm:$0xf]  ;;  %v1765_v39 = vld [vmem:[#allocation2 + $0x54] sm:$0xf0]  ;;  %v1764_v40 = vld [vmem:[#allocation2 + $0x54] sm:$0xf] }
  0xe3   :  { %365 = vmatpush.bf16.msra.mxu2 %v1480_v33  ;;  %v1461_v41 = vld [vmem:[#allocation2 + $0x58] sm:$0xf0]  ;;  %v1460_v42 = vor.u32 %v1765_v39, %v1459_v38  ;;  %v1451_v44 = vld [vmem:[#allocation2 + $0x40] sm:$0xf]  ;;  %v1763_v45 = vld [vmem:[#allocation2 + $0x44] sm:$0xf0] }
  0xe4   :  { %v1464_v43 = vor.u32 %v1764_v40, %v1461_v41  ;;  %v1762_v46 = vld [vmem:[#allocation2 + $0x44] sm:$0xf]  ;;  %v1453_v47 = vld [vmem:[#allocation2 + $0x48] sm:$0xf0]  ;;  %v1452_v48 = vor.u32 %v1763_v45, %v1451_v44  ;;  %v1443_v50 = vld [vmem:[#allocation2 + $0x30] sm:$0xf] }
  0xe5   :  { %v1456_v49 = vor.u32 %v1762_v46, %v1453_v47  ;;  %v1761_v51 = vld [vmem:[#allocation2 + $0x34] sm:$0xf0]  ;;  %v1760_v52 = vld [vmem:[#allocation2 + $0x34] sm:$0xf]  ;;  %v1445_v53 = vld [vmem:[#allocation2 + $0x38] sm:$0xf0] }
  0xe6   :  { %353 = vmatpush.bf16.msra.mxu1 %v1468_v36  ;;  %v1444_v54 = vor.u32 %v1761_v51, %v1443_v50  ;;  %v1448_v55 = vor.u32 %v1760_v52, %v1445_v53  ;;  %v1435_v56 = vld [vmem:[#allocation2 + $0x20] sm:$0xf]  ;;  %v1759_v57 = vld [vmem:[#allocation2 + $0x24] sm:$0xf0]  ;;  %v1758_v58 = vld [vmem:[#allocation2 + $0x24] sm:$0xf] }
  0xe7   :  { %366 = vmatpush.bf16.msra.mxu2 %v1472_v37  ;;  %v1437_v59 = vld [vmem:[#allocation2 + $0x28] sm:$0xf0]  ;;  %v1436_v60 = vor.u32 %v1759_v57, %v1435_v56  ;;  %v1427_v62 = vld [vmem:[#allocation2 + $0x10] sm:$0xf]  ;;  %v1757_v63 = vld [vmem:[#allocation2 + $0x14] sm:$0xf0] }
  0xe8   :  { %v1440_v61 = vor.u32 %v1758_v58, %v1437_v59  ;;  %v1756_v0 = vld [vmem:[#allocation2 + $0x14] sm:$0xf]  ;;  %v1429_v1 = vld [vmem:[#allocation2 + $0x18] sm:$0xf0]  ;;  %v1428_v2 = vor.u32 %v1757_v63, %v1427_v62  ;;  %v1419_v4 = vld [vmem:[#allocation2] sm:$0xf] }
  0xe9   :  { %v1432_v3 = vor.u32 %v1756_v0, %v1429_v1  ;;  %v1755_v5 = vld [vmem:[#allocation2 + $0x4] sm:$0xf0]  ;;  %v1754_v6 = vld [vmem:[#allocation2 + $0x4] sm:$0xf]  ;;  %v1421_v7 = vld [vmem:[#allocation2 + $0x8] sm:$0xf0] }
  0xea   :  { %354 = vmatpush.bf16.msra.mxu1 %v1460_v42  ;;  %v1420_v8 = vor.u32 %v1755_v5, %v1419_v4  ;;  %v1424_v9 = vor.u32 %v1754_v6, %v1421_v7  ;;  %v249_v11 = vld [vmem:[%s2445_s1 + $0x1] sm:$0x3] }
  0xeb   :  { %367 = vmatpush.bf16.msra.mxu2 %v1464_v43  ;;  %v268_v12 = vperm.slane %v249_v11, 0  ;;  %v269_v16 = vperm.slane %v249_v11, 1 }
  0xee   :  { %355 = vmatpush.bf16.msra.mxu1 %v1452_v48 }
  0xef   :  { %368 = vmatpush.bf16.msra.mxu2 %v1456_v49 }
  0xf2   :  { %356 = vmatpush.bf16.msra.mxu1 %v1444_v54 }
  0xf3   :  { %369 = vmatpush.bf16.msra.mxu2 %v1448_v55 }
  0xf6   :  { %357 = vmatpush.bf16.msra.mxu1 %v1436_v60 }
  0xf7   :  { %370 = vmatpush.bf16.msra.mxu2 %v1440_v61 }
  0xfa   :  { %358 = vmatpush.bf16.msra.mxu1 %v1428_v2 }
  0xfb   :  { %371 = vmatpush.bf16.msra.mxu2 %v1432_v3 }
  0xfe   :  { %359 = vmatpush.bf16.msra.mxu1 %v1420_v8 }
  0xff   :  { %372 = vmatpush.bf16.msra.mxu2 %v1424_v9 }
 0x101   :  { %360 = vmatmul.bf16.vlgmr.msra.gmra.mxu1 %v250_v10 }
 0x102   :  { %373 = vmatmul.bf16.vlgmr.msra.gmra.mxu2 %v250_v10 }
 0x17e   :  { %v361_v13 = vpop.f32.mrf.mxu1 }
 0x17f   :  { %v362_v14 = vadd.f32 %v361_v13, %v268_v12 }
 0x181   :  { %vm378_vm2 = vcmp.ge.f32.partialorder %v362_v14, 0.0  ;;  %v380_v15 = vmul.f32 0.01, %v362_v14 }
 0x183   :  { %v2178_v17 = vsel %vm378_vm2, %v362_v14, %v380_v15 }
 0x185   :  { %v374_v18 = vpop.f32.mrf.mxu2 }
 0x186   :  { %v375_v19 = vadd.f32 %v374_v18, %v269_v16  ;;  %v363_v20 = vpop.f32.mrf.mxu1 }
 0x188   :  { %vm379_vm3 = vcmp.ge.f32.partialorder %v375_v19, 0.0  ;;  %v381_v21 = vmul.f32 0.01, %v375_v19 }
 0x18a   :  { %v2180_v22 = vsel %vm379_vm3, %v375_v19, %v381_v21 }
 0x18d   :  { %v376_v23 = vpop.f32.mrf.mxu2 }
 0x18e   :  { %1868 = dma.done.wait [#allocation5 + $0x1], 8192 }
 0x18f   :  { %1869 = vsyncadd [#allocation5 + $0x1], 4294959104  ;;  %v1595_v24 = vld [vmem:[#allocation3 + $0xe0] sm:$0xf]  ;;  %v1800_v25 = vld [vmem:[#allocation3 + $0xec] sm:$0xf0] }
 0x190   :  { %v1723_v26 = vld [vmem:[#allocation3 + $0x1e0] sm:$0xf]  ;;  %v1596_v27 = vor.u32 %v1800_v25, %v1595_v24  ;;  %v1832_v28 = vld [vmem:[#allocation3 + $0x1ec] sm:$0xf0]  ;;  %v1798_v29 = vld [vmem:[#allocation3 + $0xe4] sm:$0xf] }
 0x191   :  { %v1597_v30 = vld [vmem:[#allocation3 + $0xf0] sm:$0xf0]  ;;  %v1724_v31 = vor.u32 %v1832_v28, %v1723_v26  ;;  %v1830_v33 = vld [vmem:[#allocation3 + $0x1e4] sm:$0xf]  ;;  %v1579_v35 = vld [vmem:[#allocation3 + $0xc0] sm:$0xf] }
 0x192   :  { %v1600_v32 = vor.u32 %v1798_v29, %v1597_v30  ;;  %v1725_v34 = vld [vmem:[#allocation3 + $0x1f0] sm:$0xf0]  ;;  %784 = vmatpush.bf16.msra.mxu3 %v1596_v27  ;;  %v1796_v37 = vld [vmem:[#allocation3 + $0xcc] sm:$0xf0]  ;;  %v1707_v38 = vld [vmem:[#allocation3 + $0x1c0] sm:$0xf] }
 0x193   :  { %v1728_v36 = vor.u32 %v1830_v33, %v1725_v34  ;;  %v1828_v39 = vld [vmem:[#allocation3 + $0x1cc] sm:$0xf0]  ;;  %797 = vmatpush.bf16.msrb.mxu0 %v1724_v31  ;;  %v1580_v40 = vor.u32 %v1796_v37, %v1579_v35  ;;  %v1794_v42 = vld [vmem:[#allocation3 + $0xc4] sm:$0xf]  ;;  %v1581_v43 = vld [vmem:[#allocation3 + $0xd0] sm:$0xf0] }
 0x194   :  { %810 = vmatpush.bf16.msrb.mxu1 %v1600_v32  ;;  %v1708_v41 = vor.u32 %v1828_v39, %v1707_v38  ;;  %v1826_v44 = vld [vmem:[#allocation3 + $0x1c4] sm:$0xf]  ;;  %v1584_v45 = vor.u32 %v1794_v42, %v1581_v43  ;;  %v1709_v46 = vld [vmem:[#allocation3 + $0x1d0] sm:$0xf0]  ;;  %v1563_v47 = vld [vmem:[#allocation3 + $0xa0] sm:$0xf] }
 0x195   :  { %823 = vmatpush.bf16.msrb.mxu2 %v1728_v36  ;;  %v1792_v48 = vld [vmem:[#allocation3 + $0xac] sm:$0xf0]  ;;  %v1712_v49 = vor.u32 %v1826_v44, %v1709_v46  ;;  %v1691_v50 = vld [vmem:[#allocation3 + $0x1a0] sm:$0xf]  ;;  %v1790_v52 = vld [vmem:[#allocation3 + $0xa4] sm:$0xf] }
 0x196   :  { %v1824_v51 = vld [vmem:[#allocation3 + $0x1ac] sm:$0xf0]  ;;  %785 = vmatpush.bf16.msra.mxu3 %v1580_v40  ;;  %v1564_v53 = vor.u32 %v1792_v48, %v1563_v47  ;;  %v1565_v54 = vld [vmem:[#allocation3 + $0xb0] sm:$0xf0]  ;;  %v1822_v55 = vld [vmem:[#allocation3 + $0x1a4] sm:$0xf] }
 0x197   :  { %v1693_v56 = vld [vmem:[#allocation3 + $0x1b0] sm:$0xf0]  ;;  %798 = vmatpush.bf16.msrb.mxu0 %v1708_v41  ;;  %v1692_v57 = vor.u32 %v1824_v51, %v1691_v50  ;;  %v1568_v58 = vor.u32 %v1790_v52, %v1565_v54  ;;  %v1547_v59 = vld [vmem:[#allocation3 + $0x80] sm:$0xf]  ;;  %v1788_v60 = vld [vmem:[#allocation3 + $0x8c] sm:$0xf0] }
 0x198   :  { %811 = vmatpush.bf16.msrb.mxu1 %v1584_v45  ;;  %v1675_v61 = vld [vmem:[#allocation3 + $0x180] sm:$0xf]  ;;  %v1696_v62 = vor.u32 %v1822_v55, %v1693_v56  ;;  %v1820_v63 = vld [vmem:[#allocation3 + $0x18c] sm:$0xf0]  ;;  %v1786_v0 = vld [vmem:[#allocation3 + $0x84] sm:$0xf]  ;;  %v1548_v4 = vor.u32 %v1788_v60, %v1547_v59 }
 0x199   :  { %824 = vmatpush.bf16.msrb.mxu2 %v1712_v49  ;;  %v1549_v1 = vld [vmem:[#allocation3 + $0x90] sm:$0xf0]  ;;  %v1818_v2 = vld [vmem:[#allocation3 + $0x184] sm:$0xf]  ;;  %v1676_v5 = vor.u32 %v1820_v63, %v1675_v61  ;;  %v1531_v7 = vld [vmem:[#allocation3 + $0x60] sm:$0xf] }
 0x19a   :  { %v1677_v3 = vld [vmem:[#allocation3 + $0x190] sm:$0xf0]  ;;  %786 = vmatpush.bf16.msra.mxu3 %v1564_v53  ;;  %v1552_v6 = vor.u32 %v1786_v0, %v1549_v1  ;;  %v1784_v8 = vld [vmem:[#allocation3 + $0x6c] sm:$0xf0]  ;;  %v1659_v9 = vld [vmem:[#allocation3 + $0x160] sm:$0xf] }
 0x19b   :  { %799 = vmatpush.bf16.msrb.mxu0 %v1692_v57  ;;  %v1680_v10 = vor.u32 %v1818_v2, %v1677_v3  ;;  %v1816_v11 = vld [vmem:[#allocation3 + $0x16c] sm:$0xf0]  ;;  %v1782_v12 = vld [vmem:[#allocation3 + $0x64] sm:$0xf]  ;;  %v1533_v13 = vld [vmem:[#allocation3 + $0x70] sm:$0xf0]  ;;  %v1532_v16 = vor.u32 %v1784_v8, %v1531_v7 }
 0x19c   :  { %812 = vmatpush.bf16.msrb.mxu1 %v1568_v58  ;;  %v1814_v14 = vld [vmem:[#allocation3 + $0x164] sm:$0xf]  ;;  %v1661_v15 = vld [vmem:[#allocation3 + $0x170] sm:$0xf0]  ;;  %v1660_v18 = vor.u32 %v1816_v11, %v1659_v9  ;;  %v1536_v19 = vor.u32 %v1782_v12, %v1533_v13  ;;  %v1515_v20 = vld [vmem:[#allocation3 + $0x40] sm:$0xf]  ;;  %v2184_v12 = vpack.c.bf16 %v2178_v17, %v2178_v17 }
 0x19d   :  { %825 = vmatpush.bf16.msrb.mxu2 %v1696_v62  ;;  %v1780_v21 = vld [vmem:[#allocation3 + $0x4c] sm:$0xf0]  ;;  %v1643_v23 = vld [vmem:[#allocation3 + $0x140] sm:$0xf]  ;;  %v1664_v24 = vor.u32 %v1814_v14, %v1661_v15  ;;  %v1778_v26 = vld [vmem:[#allocation3 + $0x44] sm:$0xf]  ;;  %v2188_v15 = vpack.c.bf16 %v2180_v22, %v2180_v22 }
 0x19e   :  { %787 = vmatpush.bf16.msra.mxu3 %v1548_v4  ;;  %v1812_v25 = vld [vmem:[#allocation3 + $0x14c] sm:$0xf0]  ;;  %v1517_v27 = vld [vmem:[#allocation3 + $0x50] sm:$0xf0]  ;;  %v1810_v28 = vld [vmem:[#allocation3 + $0x144] sm:$0xf]  ;;  %v1516_v30 = vor.u32 %v1780_v21, %v1515_v20 }
 0x19f   :  { %800 = vmatpush.bf16.msrb.mxu0 %v1676_v5  ;;  %v1645_v29 = vld [vmem:[#allocation3 + $0x150] sm:$0xf0]  ;;  %v1644_v31 = vor.u32 %v1812_v25, %v1643_v23  ;;  %v1520_v32 = vor.u32 %v1778_v26, %v1517_v27  ;;  %v1499_v33 = vld [vmem:[#allocation3 + $0x20] sm:$0xf]  ;;  %v1776_v34 = vld [vmem:[#allocation3 + $0x2c] sm:$0xf0] }
 0x1a0   :  { %813 = vmatpush.bf16.msrb.mxu1 %v1552_v6  ;;  %v1627_v35 = vld [vmem:[#allocation3 + $0x120] sm:$0xf]  ;;  %v1648_v36 = vor.u32 %v1810_v28, %v1645_v29  ;;  %v1808_v37 = vld [vmem:[#allocation3 + $0x12c] sm:$0xf0]  ;;  %v1774_v38 = vld [vmem:[#allocation3 + $0x24] sm:$0xf]  ;;  %v1500_v42 = vor.u32 %v1776_v34, %v1499_v33 }
 0x1a1   :  { %826 = vmatpush.bf16.msrb.mxu2 %v1680_v10  ;;  %v1501_v39 = vld [vmem:[#allocation3 + $0x30] sm:$0xf0]  ;;  %v1806_v40 = vld [vmem:[#allocation3 + $0x124] sm:$0xf]  ;;  %v1483_v43 = vld [vmem:[#allocation3] sm:$0xf]  ;;  %v1628_v45 = vor.u32 %v1808_v37, %v1627_v35 }
 0x1a2   :  { %788 = vmatpush.bf16.msra.mxu3 %v1532_v16  ;;  %v1629_v41 = vld [vmem:[#allocation3 + $0x130] sm:$0xf0]  ;;  %v1772_v44 = vld [vmem:[#allocation3 + $0xc] sm:$0xf0]  ;;  %v1504_v46 = vor.u32 %v1774_v38, %v1501_v39  ;;  %v1611_v47 = vld [vmem:[#allocation3 + $0x100] sm:$0xf] }
 0x1a3   :  { %801 = vmatpush.bf16.msrb.mxu0 %v1660_v18  ;;  %v1804_v48 = vld [vmem:[#allocation3 + $0x10c] sm:$0xf0]  ;;  %v1770_v49 = vld [vmem:[#allocation3 + $0x4] sm:$0xf]  ;;  %v1632_v50 = vor.u32 %v1806_v40, %v1629_v41  ;;  %v1485_v51 = vld [vmem:[#allocation3 + $0x10] sm:$0xf0]  ;;  %v1484_v57 = vor.u32 %v1772_v44, %v1483_v43 }
 0x1a4   :  { %814 = vmatpush.bf16.msrb.mxu1 %v1536_v19  ;;  %v1802_v52 = vld [vmem:[#allocation3 + $0x104] sm:$0xf]  ;;  %v1613_v53 = vld [vmem:[#allocation3 + $0x110] sm:$0xf0]  ;;  %v1603_v54 = vld [vmem:[#allocation3 + $0xe8] sm:$0xf]  ;;  %v1612_v61 = vor.u32 %v1804_v48, %v1611_v47  ;;  %v1488_v62 = vor.u32 %v1770_v49, %v1485_v51 }
 0x1a5   :  { %827 = vmatpush.bf16.msrb.mxu2 %v1664_v24  ;;  %v1801_v55 = vld [vmem:[#allocation3 + $0xf4] sm:$0xf0]  ;;  %v1731_v56 = vld [vmem:[#allocation3 + $0x1e8] sm:$0xf]  ;;  %v1799_v59 = vld [vmem:[#allocation3 + $0xec] sm:$0xf]  ;;  %v1616_v1 = vor.u32 %v1802_v52, %v1613_v53 }
 0x1a6   :  { %789 = vmatpush.bf16.msra.mxu3 %v1516_v30  ;;  %v1833_v58 = vld [vmem:[#allocation3 + $0x1f4] sm:$0xf0]  ;;  %v1605_v60 = vld [vmem:[#allocation3 + $0xf8] sm:$0xf0]  ;;  %v1831_v63 = vld [vmem:[#allocation3 + $0x1ec] sm:$0xf]  ;;  %v1604_v2 = vor.u32 %v1801_v55, %v1603_v54 }
 0x1a7   :  { %802 = vmatpush.bf16.msrb.mxu0 %v1644_v31  ;;  %v1733_v0 = vld [vmem:[#allocation3 + $0x1f8] sm:$0xf0]  ;;  %v1732_v3 = vor.u32 %v1833_v58, %v1731_v56  ;;  %v1608_v4 = vor.u32 %v1799_v59, %v1605_v60  ;;  %v1587_v5 = vld [vmem:[#allocation3 + $0xc8] sm:$0xf]  ;;  %v1797_v6 = vld [vmem:[#allocation3 + $0xd4] sm:$0xf0] }
 0x1a8   :  { %815 = vmatpush.bf16.msrb.mxu1 %v1520_v32  ;;  %v1715_v7 = vld [vmem:[#allocation3 + $0x1c8] sm:$0xf]  ;;  %v1736_v8 = vor.u32 %v1831_v63, %v1733_v0  ;;  %v1829_v9 = vld [vmem:[#allocation3 + $0x1d4] sm:$0xf0]  ;;  %v1795_v10 = vld [vmem:[#allocation3 + $0xcc] sm:$0xf]  ;;  %v1588_v16 = vor.u32 %v1797_v6, %v1587_v5 }
 0x1a9   :  { %828 = vmatpush.bf16.msrb.mxu2 %v1648_v36  ;;  %v1589_v11 = vld [vmem:[#allocation3 + $0xd8] sm:$0xf0]  ;;  %v1827_v13 = vld [vmem:[#allocation3 + $0x1cc] sm:$0xf]  ;;  %v1716_v18 = vor.u32 %v1829_v9, %v1715_v7  ;;  %v1571_v20 = vld [vmem:[#allocation3 + $0xa8] sm:$0xf] }
 0x1aa   :  { %790 = vmatpush.bf16.msra.mxu3 %v1500_v42  ;;  %v1717_v14 = vld [vmem:[#allocation3 + $0x1d8] sm:$0xf0]  ;;  %v1592_v19 = vor.u32 %v1795_v10, %v1589_v11  ;;  %v1793_v21 = vld [vmem:[#allocation3 + $0xb4] sm:$0xf0]  ;;  %v1699_v23 = vld [vmem:[#allocation3 + $0x1a8] sm:$0xf] }
 0x1ab   :  { %803 = vmatpush.bf16.msrb.mxu0 %v1628_v45  ;;  %v1720_v17 = vor.u32 %v1827_v13, %v1717_v14  ;;  %v1825_v24 = vld [vmem:[#allocation3 + $0x1b4] sm:$0xf0]  ;;  %v1791_v25 = vld [vmem:[#allocation3 + $0xac] sm:$0xf]  ;;  %v1573_v26 = vld [vmem:[#allocation3 + $0xb8] sm:$0xf0]  ;;  %v1572_v28 = vor.u32 %v1793_v21, %v1571_v20 }
 0x1ac   :  { %816 = vmatpush.bf16.msrb.mxu1 %v1504_v46  ;;  %v1823_v27 = vld [vmem:[#allocation3 + $0x1ac] sm:$0xf]  ;;  %v1701_v22 = vld [vmem:[#allocation3 + $0x1b8] sm:$0xf0]  ;;  %v1700_v29 = vor.u32 %v1825_v24, %v1699_v23  ;;  %v1576_v30 = vor.u32 %v1791_v25, %v1573_v26  ;;  %v1555_v31 = vld [vmem:[#allocation3 + $0x88] sm:$0xf] }
 0x1ad   :  { %829 = vmatpush.bf16.msrb.mxu2 %v1632_v50  ;;  %v1789_v32 = vld [vmem:[#allocation3 + $0x94] sm:$0xf0]  ;;  %v1683_v33 = vld [vmem:[#allocation3 + $0x188] sm:$0xf]  ;;  %v1704_v34 = vor.u32 %v1823_v27, %v1701_v22  ;;  %v1787_v36 = vld [vmem:[#allocation3 + $0x8c] sm:$0xf] }
 0x1ae   :  { %791 = vmatpush.bf16.msra.mxu3 %v1484_v57  ;;  %v1821_v35 = vld [vmem:[#allocation3 + $0x194] sm:$0xf0]  ;;  %v1557_v37 = vld [vmem:[#allocation3 + $0x98] sm:$0xf0]  ;;  %v1819_v38 = vld [vmem:[#allocation3 + $0x18c] sm:$0xf]  ;;  %v1556_v41 = vor.u32 %v1789_v32, %v1555_v31 }
 0x1af   :  { %804 = vmatpush.bf16.msrb.mxu0 %v1612_v61  ;;  %v1685_v39 = vld [vmem:[#allocation3 + $0x198] sm:$0xf0]  ;;  %v1539_v40 = vld [vmem:[#allocation3 + $0x68] sm:$0xf]  ;;  %v1785_v42 = vld [vmem:[#allocation3 + $0x74] sm:$0xf0]  ;;  %v1684_v45 = vor.u32 %v1821_v35, %v1683_v33  ;;  %v1560_v46 = vor.u32 %v1787_v36, %v1557_v37 }
 0x1b0   :  { %817 = vmatpush.bf16.msrb.mxu1 %v1488_v62  ;;  %v1667_v43 = vld [vmem:[#allocation3 + $0x168] sm:$0xf]  ;;  %v1817_v44 = vld [vmem:[#allocation3 + $0x174] sm:$0xf0]  ;;  %v1783_v47 = vld [vmem:[#allocation3 + $0x6c] sm:$0xf]  ;;  %v1688_v50 = vor.u32 %v1819_v38, %v1685_v39  ;;  %v1540_v52 = vor.u32 %v1785_v42, %v1539_v40 }
 0x1b1   :  { %830 = vmatpush.bf16.msrb.mxu2 %v1616_v1  ;;  %792 = vmatmul.bf16.vlgmr.msra.gmra.mxu3 %v2184_v12  ;;  %v1541_v48 = vld [vmem:[#allocation3 + $0x78] sm:$0xf0]  ;;  %v1815_v49 = vld [vmem:[#allocation3 + $0x16c] sm:$0xf]  ;;  %v1668_v53 = vor.u32 %v1817_v44, %v1667_v43  ;;  %v1523_v55 = vld [vmem:[#allocation3 + $0x48] sm:$0xf] }
 0x1b2   :  { %836 = vmatpush.bf16.msrb.mxu3 %v1604_v2  ;;  %805 = vmatmul.bf16.vlgmr.msrb.gmra.mxu0 %v2188_v15  ;;  %v1669_v51 = vld [vmem:[#allocation3 + $0x178] sm:$0xf0]  ;;  %v1544_v54 = vor.u32 %v1783_v47, %v1541_v48  ;;  %v1781_v56 = vld [vmem:[#allocation3 + $0x54] sm:$0xf0]  ;;  %v1651_v57 = vld [vmem:[#allocation3 + $0x148] sm:$0xf] }
 0x1b3   :  { %849 = vmatpush.bf16.msra.mxu0 %v1732_v3  ;;  %818 = vmatmul.bf16.vlgmr.msrb.gmra.mxu1 %v2184_v12  ;;  %v1672_v58 = vor.u32 %v1815_v49, %v1669_v51  ;;  %v1813_v59 = vld [vmem:[#allocation3 + $0x154] sm:$0xf0]  ;;  %v1779_v60 = vld [vmem:[#allocation3 + $0x4c] sm:$0xf]  ;;  %v1525_v61 = vld [vmem:[#allocation3 + $0x58] sm:$0xf0]  ;;  %v1524_v0 = vor.u32 %v1781_v56, %v1523_v55 }
 0x1b4   :  { %862 = vmatpush.bf16.msra.mxu1 %v1608_v4  ;;  %831 = vmatmul.bf16.vlgmr.msrb.gmra.mxu2 %v2188_v15  ;;  %v1811_v62 = vld [vmem:[#allocation3 + $0x14c] sm:$0xf]  ;;  %v1653_v63 = vld [vmem:[#allocation3 + $0x158] sm:$0xf0]  ;;  %v1652_v1 = vor.u32 %v1813_v59, %v1651_v57  ;;  %v1528_v2 = vor.u32 %v1779_v60, %v1525_v61  ;;  %v1507_v3 = vld [vmem:[#allocation3 + $0x28] sm:$0xf] }
 0x1b5   :  { %875 = vmatpush.bf16.msra.mxu2 %v1736_v8  ;;  %v1777_v4 = vld [vmem:[#allocation3 + $0x34] sm:$0xf0]  ;;  %v1635_v5 = vld [vmem:[#allocation3 + $0x128] sm:$0xf]  ;;  %v1656_v6 = vor.u32 %v1811_v62, %v1653_v63  ;;  %v1775_v8 = vld [vmem:[#allocation3 + $0x2c] sm:$0xf] }
 0x1b6   :  { %837 = vmatpush.bf16.msrb.mxu3 %v1588_v16  ;;  %v1809_v7 = vld [vmem:[#allocation3 + $0x134] sm:$0xf0]  ;;  %v1509_v9 = vld [vmem:[#allocation3 + $0x38] sm:$0xf0]  ;;  %v1807_v10 = vld [vmem:[#allocation3 + $0x12c] sm:$0xf]  ;;  %v1508_v13 = vor.u32 %v1777_v4, %v1507_v3 }
 0x1b7   :  { %850 = vmatpush.bf16.msra.mxu0 %v1716_v18  ;;  %v1637_v11 = vld [vmem:[#allocation3 + $0x138] sm:$0xf0]  ;;  %v1636_v14 = vor.u32 %v1809_v7, %v1635_v5  ;;  %v1512_v16 = vor.u32 %v1775_v8, %v1509_v9  ;;  %v1491_v18 = vld [vmem:[#allocation3 + $0x8] sm:$0xf]  ;;  %v1805_v23 = vld [vmem:[#allocation3 + $0x114] sm:$0xf0] }
 0x1b8   :  { %863 = vmatpush.bf16.msra.mxu1 %v1592_v19  ;;  %v1773_v19 = vld [vmem:[#allocation3 + $0x14] sm:$0xf0]  ;;  %v1619_v20 = vld [vmem:[#allocation3 + $0x108] sm:$0xf]  ;;  %v1640_v21 = vor.u32 %v1807_v10, %v1637_v11  ;;  %v1493_v24 = vld [vmem:[#allocation3 + $0x18] sm:$0xf0] }
 0x1b9   :  { %876 = vmatpush.bf16.msra.mxu2 %v1720_v17  ;;  %v1771_v17 = vld [vmem:[#allocation3 + $0xc] sm:$0xf]  ;;  %v1621_v26 = vld [vmem:[#allocation3 + $0x118] sm:$0xf0]  ;;  %v1492_v27 = vor.u32 %v1773_v19, %v1491_v18  ;;  %v1620_v22 = vor.u32 %v1805_v23, %v1619_v20  ;;  %v908_v31 = vld [vmem:[%s2444_s0 + $0x90] sm:$0xff]  ;;  %vm934_vm4 = vcmask 64512  }
 0x1ba   :  { %838 = vmatpush.bf16.msrb.mxu3 %v1572_v28  ;;  %v1803_v25 = vld [vmem:[#allocation3 + $0x10c] sm:$0xf]  ;;  %v1496_v28 = vor.u32 %v1771_v17, %v1493_v24  ;;  %v904_v33 = vld [vmem:[%s2444_s0 + $0x70] sm:$0xff]  ;;  %v902_v36 = vld [vmem:[%s2444_s0 + $0x60] sm:$0xff]  ;;  %vm970_vm6 = vcmask 523264   ;;  %vm1244_vm11 = vcmask 254976  }
 0x1bb   :  { %851 = vmatpush.bf16.msra.mxu0 %v1700_v29  ;;  %v1624_v29 = vor.u32 %v1803_v25, %v1621_v26  ;;  %v907_v32 = vld [vmem:[%s2444_s0 + $0x88] sm:$0xff]  ;;  %v901_v38 = vld [vmem:[%s2444_s0 + $0x58] sm:$0xff]  ;;  %v900_v43 = vld [vmem:[%s2444_s0 + $0x50] sm:$0xff] }
 0x1bc   :  { %864 = vmatpush.bf16.msra.mxu1 %v1576_v30  ;;  %v909_v30 = vld [vmem:[%s2444_s0 + $0x98] sm:$0xff]  ;;  %v903_v35 = vld [vmem:[%s2444_s0 + $0x68] sm:$0xff]  ;;  %v898_v49 = vld [vmem:[%s2444_s0 + $0x40] sm:$0xff] }
 0x1bd   :  { %877 = vmatpush.bf16.msra.mxu2 %v1704_v34  ;;  %v388_v34 = vld [vmem:[%s2445_s1 + $0x3] sm:$0xf]  ;;  %v895_v55 = vld [vmem:[%s2444_s0 + $0x28] sm:$0xff]  ;;  %v893_v10 = vld [vmem:[%s2446_s2 + $0x38] sm:$0xff] }
 0x1be   :  { %839 = vmatpush.bf16.msrb.mxu3 %v1556_v41  ;;  %v457_v37 = vperm.slane %v388_v34, 1  ;;  %v456_v41 = vperm.slane %v388_v34, 0  ;;  %v894_v57 = vld [vmem:[%s2444_s0 + $0x20] sm:$0xff]  ;;  %v459_v60 = vperm.slane %v388_v34, 3  ;;  %v458_v62 = vperm.slane %v388_v34, 2  ;;  %v964_v19 = vld [vmem:[%s2444_s0 + $0xb8] sm:$0xff] }
 0x1bf   :  { %852 = vmatpush.bf16.msra.mxu0 %v1684_v45  ;;  %v899_v45 = vld [vmem:[%s2444_s0 + $0x48] sm:$0xff]  ;;  %v965_v18 = vld [vmem:[%s2444_s0 + $0xc0] sm:$0xff]  ;;  %v963_v20 = vld [vmem:[%s2444_s0 + $0xb0] sm:$0xff] }
 0x1c0   :  { %865 = vmatpush.bf16.msra.mxu1 %v1560_v46  ;;  %v961_v23 = vld [vmem:[%s2444_s0 + $0xa0] sm:$0xff] }
 0x1c1   :  { %878 = vmatpush.bf16.msra.mxu2 %v1688_v50  ;;  %v1859_v17 = vld [vmem:[%s2445_s1 + $0x7] ss:$0 sm:$0xff] }
 0x1c2   :  { %840 = vmatpush.bf16.msrb.mxu3 %v1540_v52  ;;  %v897_v52 = vld [vmem:[%s2444_s0 + $0x38] sm:$0xff] }
 0x1c3   :  { %853 = vmatpush.bf16.msra.mxu0 %v1668_v53 }
 0x1c4   :  { %866 = vmatpush.bf16.msra.mxu1 %v1544_v54  ;;  %v896_v54 = vld [vmem:[%s2444_s0 + $0x30] sm:$0xff] }
 0x1c5   :  { %879 = vmatpush.bf16.msra.mxu2 %v1672_v58 }
 0x1c6   :  { %841 = vmatpush.bf16.msrb.mxu3 %v1524_v0 }
 0x1c7   :  { %854 = vmatpush.bf16.msra.mxu0 %v1652_v1 }
 0x1c8   :  { %867 = vmatpush.bf16.msra.mxu1 %v1528_v2 }
 0x1c9   :  { %880 = vmatpush.bf16.msra.mxu2 %v1656_v6 }
 0x1ca   :  { %842 = vmatpush.bf16.msrb.mxu3 %v1508_v13  ;;  %v968_v13 = vld [vmem:[%s2444_s0 + $0xd8] sm:$0xff] }
 0x1cb   :  { %855 = vmatpush.bf16.msra.mxu0 %v1636_v14  ;;  %v967_v14 = vld [vmem:[%s2444_s0 + $0xd0] sm:$0xff] }
 0x1cc   :  { %868 = vmatpush.bf16.msra.mxu1 %v1512_v16  ;;  %v966_v16 = vld [vmem:[%s2444_s0 + $0xc8] sm:$0xff] }
 0x1cd   :  { %881 = vmatpush.bf16.msra.mxu2 %v1640_v21  ;;  %v962_v21 = vld [vmem:[%s2444_s0 + $0xa8] sm:$0xff] }
 0x1ce   :  { %843 = vmatpush.bf16.msrb.mxu3 %v1492_v27 }
 0x1cf   :  { %856 = vmatpush.bf16.msra.mxu0 %v1620_v22 }
 0x1d0   :  { %869 = vmatpush.bf16.msra.mxu1 %v1496_v28  ;;  %v1051_v28 = vld [vmem:[%s2444_s0 + $0x118] sm:$0xff] }
 0x1d1   :  { %882 = vmatpush.bf16.msra.mxu2 %v1624_v29  ;;  %844 = vmatmul.bf16.vlgmr.msrb.gmra.mxu3 %v2184_v12  ;;  %v1050_v29 = vld [vmem:[%s2444_s0 + $0x110] sm:$0xff] }
 0x1d2   :  { %857 = vmatmul.bf16.vlgmr.msra.gmra.mxu0 %v2188_v15  ;;  %911 = vmatpush.msra.mxu3 %v909_v30  ;;  %v1049_v30 = vld [vmem:[%s2444_s0 + $0x108] sm:$0xff] }
 0x1d3   :  { %870 = vmatmul.bf16.vlgmr.msra.gmra.mxu1 %v2184_v12  ;;  %v906_v12 = vld [vmem:[%s2444_s0 + $0x80] sm:$0xff] }
 0x1d4   :  { %883 = vmatmul.bf16.vlgmr.msra.gmra.mxu2 %v2188_v15  ;;  %912 = vmatpush.msra.mxu3 %v908_v31  ;;  %v905_v15 = vld [vmem:[%s2444_s0 + $0x78] sm:$0xff]  ;;  %v1048_v31 = vld [vmem:[%s2444_s0 + $0x100] sm:$0xff] }
 0x1d5   :  { %1067 = vmatpush.msrb.mxu1 %v1051_v28 }
 0x1d6   :  { %913 = vmatpush.msra.mxu3 %v907_v32  ;;  %v1047_v32 = vld [vmem:[%s2444_s0 + $0xf8] sm:$0xff] }
 0x1d7   :  { %1068 = vmatpush.msrb.mxu1 %v1050_v29  ;;  %v2410_v29 = vld [vmem:[%s2446_s2 + $0x28] sm:$0x3] }
 0x1d8   :  { %914 = vmatpush.msra.mxu3 %v906_v12  ;;  %v1046_v12 = vld [vmem:[%s2444_s0 + $0xf0] sm:$0xff] }
 0x1d9   :  { %1069 = vmatpush.msrb.mxu1 %v1049_v30  ;;  %v1137_v30 = vld [vmem:[%s2446_s2 + $0x18] sm:$0x3] }
 0x1da   :  { %915 = vmatpush.msra.mxu3 %v905_v15  ;;  %v1045_v15 = vld [vmem:[%s2444_s0 + $0xe8] sm:$0xff] }
 0x1db   :  { %1070 = vmatpush.msrb.mxu1 %v1048_v31 }
 0x1dc   :  { %916 = vmatpush.msra.mxu3 %v904_v33  ;;  %v1860_v33 = vld [vmem:[%s2445_s1 + $0x8] ss:$0 sm:$0xff] }
 0x1dd   :  { %1071 = vmatpush.msrb.mxu1 %v1047_v32  ;;  %v1177_v32 = vmul.f32 %v1137_v30, %v2410_v29 }
 0x1de   :  { %917 = vmatpush.msra.mxu3 %v903_v35 }
 0x1df   :  { %1072 = vmatpush.msrb.mxu1 %v1046_v12  ;;  %v1138_v12 = vld [vmem:[%s2446_s2 + $0x20] sm:$0x3] }
 0x1e0   :  { %918 = vmatpush.msra.mxu3 %v902_v36 }
 0x1e1   :  { %1073 = vmatpush.msrb.mxu1 %v1045_v15 }
 0x1e2   :  { %919 = vmatpush.msra.mxu3 %v901_v38 }
 0x1e4   :  { %920 = vmatpush.msra.mxu3 %v900_v43  ;;  %v1083_v43 = vld [vmem:[%s2444_s0 + $0x128] sm:$0xff] }
 0x1e6   :  { %921 = vmatpush.msra.mxu3 %v899_v45  ;;  %v2329_v45 = vld [vmem:[%s2444_s0 + $0x158] sm:$0xff] }
 0x1e8   :  { %922 = vmatpush.msra.mxu3 %v898_v49 }
 0x1ea   :  { %923 = vmatpush.msra.mxu3 %v897_v52  ;;  %v2347_v52 = vld [vmem:[%s2444_s0 + $0x148] sm:$0xff] }
 0x1ec   :  { %924 = vmatpush.msra.mxu3 %v896_v54  ;;  %v2360_v54 = vld [vmem:[%s2446_s2 + $0x10] sm:$0x3] }
 0x1ed   :  { %vm1166_vm9 = vcmp.lt.f32.partialorder %v2360_v54, 0.0  ;;  %vm1165_vm10 = vcmp.gt.f32.partialorder %v2360_v54, 0.0 }
 0x1ee   :  { %925 = vmatpush.msra.mxu3 %v895_v55  ;;  %v1870_v55 = vmov 5  }
 0x1ef   :  { %1851 = vset.pattern.permute.xlu2 %v1870_v55 }
 0x1f0   :  { %926 = vmatpush.msra.mxu3 %v894_v57  ;;  %v1872_v57 = vmov 1  }
 0x1f1   :  { %1847 = vset.pattern.permute.xlu0 %v1872_v57 }
 0x22f   :  { %v806_v40 = vpop.f32.mrf.mxu0 }
 0x230   :  { %v819_v39 = vpop.f32.mrf.mxu1 }
 0x231   :  { %v820_v42 = vadd.f32 %v819_v39, %v457_v37  ;;  %v1020_v37 = vld [vmem:[%s2446_s2 + $0x30] sm:$0x3]  ;;  %v1044_v39 = vld [vmem:[%s2444_s0 + $0xe0] sm:$0xff] }
 0x232   :  { %1074 = vmatpush.msrb.mxu1 %v1044_v39  ;;  %v1139_v39 = vlaneseq }
 0x234   :  { %v793_v44 = vpop.f32.mrf.mxu3 }
 0x235   :  { %v794_v46 = vadd.f32 %v793_v44, %v456_v41  ;;  %v1082_v44 = vld [vmem:[%s2444_s0 + $0x120] sm:$0xff] }
 0x237   :  { %v832_v47 = vpop.f32.mrf.mxu2  ;;  %v807_v50 = vadd.f32 %v806_v40, %v794_v46  ;;  %v808_v53 = vpop.f32.mrf.mxu0  ;;  %v1085_v40 = vld [vmem:[%s2444_s0 + $0x138] sm:$0xff]  ;;  %v1861_v46 = vld [vmem:[%s2445_s1 + $0x9] ss:$0 sm:$0xff] }
 0x238   :  { %v833_v48 = vadd.f32 %v832_v47, %v820_v42  ;;  %v821_v51 = vpop.f32.mrf.mxu1  ;;  %1106 = vmatpush.msrb.mxu2 %v1085_v40  ;;  %v1084_v42 = vld [vmem:[%s2444_s0 + $0x130] sm:$0xff]  ;;  %v2354_v53 = vld [vmem:[%s2444_s0 + $0x140] sm:$0xff]  ;;  %v1140_v40 = vshrl.u32 %v1139_v39, 7 }
 0x239   :  { %888 = vst [vmem:[#allocation4] sm:$0x3] %v807_v50  ;;  %v2340_v51 = vld [vmem:[%s2444_s0 + $0x150] sm:$0xff] }
 0x23a   :  { %889 = vst [vmem:[#allocation4 + $0x2] sm:$0x3] %v833_v48  ;;  %1107 = vmatpush.msrb.mxu2 %v1084_v42  ;;  %vm1141_vm12 = vcmp.eq.s32.totalorder %v1140_v40, 0 }
 0x23c   :  { %v795_v56 = vpop.f32.mrf.mxu3  ;;  %1108 = vmatpush.msrb.mxu2 %v1083_v43 }
 0x23d   :  { %v1871_v56 = vmov 0  }
 0x23e   :  { %1109 = vmatpush.msrb.mxu2 %v1082_v44  ;;  %1849 = vset.pattern.permute.xlu1 %v1871_v56 }
 0x23f   :  { %v834_v58 = vpop.f32.mrf.mxu2 }
 0x240   :  { %1258 = vmatpush.msra.mxu2 %v2329_v45  ;;  %v1862_v58 = vld [vmem:[%s2445_s1 + $0xa] ss:$0 sm:$0xff] }
 0x242   :  { %1259 = vmatpush.msra.mxu2 %v2340_v51 }
 0x244   :  { %1260 = vmatpush.msra.mxu2 %v2347_v52 }
 0x246   :  { %1261 = vmatpush.msra.mxu2 %v2354_v53 }
 0x24f   :  { %v858_v59 = vpop.f32.mrf.mxu0 }
 0x250   :  { %v871_v61 = vpop.f32.mrf.mxu1 }
 0x251   :  { %v872_v63 = vadd.f32 %v871_v61, %v459_v60 }
 0x254   :  { %v845_v0 = vpop.f32.mrf.mxu3 }
 0x255   :  { %v846_v1 = vadd.f32 %v845_v0, %v458_v62  ;;  %v1863_v0 = vld [vmem:[%s2445_s1 + $0xb] ss:$0 sm:$0xff] }
 0x257   :  { %v884_v2 = vpop.f32.mrf.mxu2  ;;  %v859_v3 = vadd.f32 %v858_v59, %v846_v1  ;;  %v860_v5 = vpop.f32.mrf.mxu0 }
 0x258   :  { %v885_v4 = vadd.f32 %v884_v2, %v872_v63  ;;  %v873_v6 = vpop.f32.mrf.mxu1  ;;  %v1875_v5 = vmov 2  }
 0x259   :  { %890 = vst [vmem:[#allocation4 + $0x4] sm:$0x3] %v859_v3  ;;  %v1873_v3 = vmov 6   ;;  %v1876_v6 = vmov 7  }
 0x25a   :  { %891 = vst [vmem:[#allocation4 + $0x6] sm:$0x3] %v885_v4  ;;  %v1874_v4 = vmov 3  }
 0x25c   :  { %v847_v7 = vpop.f32.mrf.mxu3 }
 0x25d   :  { %v1877_v7 = vmov 4  }
 0x25f   :  { %v886_v8 = vpop.f32.mrf.mxu2 }
 0x260   :  { %v1878_v8 = vmov 9  }
 0x261   :  { %v892_v9 = vld [vmem:[#allocation4] sm:$0xff] }
 0x262   :  { %927 = vmatmul.f32.vlgmr.msra.gmra.mxu3 %v892_v9  ;;  %v1879_v9 = vmov 8  }
 0x2e5   :  { %v928_v11 = vpop.f32.mrf.mxu3 }
 0x2e6   :  { %953 = vmatpush.msrb.mxu0 %v928_v11  ;;  %v1131_v11 = vld [vmem:[%s2446_s2 + $0x58] sm:$0xff] }
 0x2e7   :  { %1737 = vmatmul.msk.f32.vlgmr.msrb.gmra.mxu0 %vm934_vm4, %v893_v10 }
 0x2e8   :  { %982 = vmatpush.msra.mxu0 %v968_v13  ;;  %v1135_v13 = vld [vmem:[%s2446_s2 + $0x78] sm:$0xff] }
 0x2e9   :  { %1226 = vmatpush.msra.mxu1 %v1135_v13 }
 0x2ea   :  { %983 = vmatpush.msra.mxu0 %v967_v14  ;;  %v1130_v14 = vld [vmem:[%s2446_s2 + $0x50] sm:$0xff] }
 0x2ec   :  { %984 = vmatpush.msra.mxu0 %v966_v16  ;;  %v1134_v16 = vld [vmem:[%s2446_s2 + $0x70] sm:$0xff] }
 0x2ed   :  { %1227 = vmatpush.msra.mxu1 %v1134_v16 }
 0x2ee   :  { %985 = vmatpush.msra.mxu0 %v965_v18  ;;  %v1129_v18 = vld [vmem:[%s2446_s2 + $0x48] sm:$0xff] }
 0x2f0   :  { %986 = vmatpush.msra.mxu0 %v964_v19  ;;  %v1133_v19 = vld [vmem:[%s2446_s2 + $0x68] sm:$0xff] }
 0x2f1   :  { %1228 = vmatpush.msra.mxu1 %v1133_v19 }
 0x2f2   :  { %987 = vmatpush.msra.mxu0 %v963_v20  ;;  %v1128_v20 = vld [vmem:[%s2446_s2 + $0x40] sm:$0xff] }
 0x2f4   :  { %988 = vmatpush.msra.mxu0 %v962_v21  ;;  %v1132_v21 = vld [vmem:[%s2446_s2 + $0x60] sm:$0xff] }
 0x2f5   :  { %1229 = vmatpush.msra.mxu1 %v1132_v21 }
 0x2f6   :  { %989 = vmatpush.msra.mxu0 %v961_v23  ;;  %v1881_v23 = vmov 0.0  }
 0x364   :  { %v955_v24 = vpop.f32.mrf.mxu0 }
 0x365   :  { %v956_v25 = vadd.f32 %v1859_v17, %v955_v24  ;;  %v1167_v17 = vsel %vm1166_vm9, -1.0, %v1881_v23 }
 0x366   :  { %v1168_v24 = vsel %vm1165_vm10, 1.0, %v1167_v17 }
 0x367   :  { %vm958_vm5 = vcmp.ge.f32.partialorder %v956_v25, 0.0  ;;  %v959_v26 = vmul.f32 0.01, %v956_v25 }
 0x369   :  { %v960_v27 = vsel %vm958_vm5, %v956_v25, %v959_v26  ;;  %v2404_v25 = vld [vmem:[%s2446_s2 + $0x8] sm:$0x3] }
 0x36a   :  { %1738 = vmatmul.msk.f32.vlgmr.msra.gmra.mxu0 %vm970_vm6, %v960_v27 }
 0x3e7   :  { %v991_v22 = vpop.f32.mrf.mxu0 }
 0x3e8   :  { %1012 = vmatpush.msrb.mxu3 %v991_v22 }
 0x3e9   :  { %1739 = vmatmul.msk.f32.vlgmr.msrb.gmra.mxu3 %vm934_vm4, %v893_v10  ;;  %v1880_v10 = vmov 10  }
 0x3ea   :  { %1157 = vmatpush.msra.mxu3 %v2329_v45 }
 0x3ec   :  { %1158 = vmatpush.msra.mxu3 %v2340_v51 }
 0x3ee   :  { %1159 = vmatpush.msra.mxu3 %v2347_v52 }
 0x3f0   :  { %1160 = vmatpush.msra.mxu3 %v2354_v53 }
 0x3f1   :  { %1743 = vmatmul.msk.f32.vlgmr.msra.gmra.mxu3 %vm218_vm0, %v2360_v54 }
 0x3f2   :  { %1306 = vmatpush.msrb.mxu3 %v1131_v11 }
 0x3f4   :  { %1307 = vmatpush.msrb.mxu3 %v1130_v14 }
 0x3f6   :  { %1308 = vmatpush.msrb.mxu3 %v1129_v18 }
 0x3f8   :  { %1309 = vmatpush.msrb.mxu3 %v1128_v20 }
 0x46c   :  { %v1014_v34 = vpop.f32.mrf.mxu3 }
 0x46d   :  { %v1015_v35 = vadd.f32 %v1860_v33, %v1014_v34 }
 0x46f   :  { %vm1017_vm7 = vcmp.ge.f32.partialorder %v1015_v35, 0.0  ;;  %v1018_v36 = vmul.f32 0.01, %v1015_v35 }
 0x471   :  { %v1019_v38 = vsel %vm1017_vm7, %v1015_v35, %v1018_v36 }
 0x472   :  { %1039 = vmatpush.msrb.mxu0 %v1019_v38 }
 0x473   :  { %1740 = vmatmul.msk.f32.vlgmr.msrb.gmra.mxu0 %vm934_vm4, %v1020_v37 }
 0x474   :  { %1206 = vmatpush.msra.mxu0 %v1131_v11  ;;  %v1162_v26 = vpop.f32.mrf.mxu3 }
 0x475   :  { %v1169_v28 = vsub.f32 %v1162_v26, %v2404_v25 }
 0x476   :  { %1207 = vmatpush.msra.mxu0 %v1130_v14 }
 0x478   :  { %1208 = vmatpush.msra.mxu0 %v1129_v18 }
 0x47a   :  { %1209 = vmatpush.msra.mxu0 %v1128_v20 }
 0x47c   :  { %1326 = vmatpush.msrb.mxu0 %v1135_v13 }
 0x47e   :  { %1327 = vmatpush.msrb.mxu0 %v1134_v16 }
 0x480   :  { %1328 = vmatpush.msrb.mxu0 %v1133_v19 }
 0x482   :  { %1329 = vmatpush.msrb.mxu0 %v1132_v21 }
 0x4f0   :  { %v1041_v41 = vpop.f32.mrf.mxu0 }
 0x4f1   :  { %1741 = vmatmul.msk.f32.vlgmr.msrb.gmra.mxu1 %vm970_vm6, %v1041_v41 }
 0x4f2   :  { %1356 = vmatpush.msrb.mxu1 %v2329_v45 }
 0x4f4   :  { %1357 = vmatpush.msrb.mxu1 %v2340_v51 }
 0x4f6   :  { %1358 = vmatpush.msrb.mxu1 %v2347_v52 }
 0x4f8   :  { %1359 = vmatpush.msrb.mxu1 %v2354_v53 }
 0x56e   :  { %v1076_v47 = vpop.f32.mrf.mxu1 }
 0x56f   :  { %v1077_v48 = vadd.f32 %v1861_v46, %v1076_v47 }
 0x571   :  { %vm1079_vm8 = vcmp.ge.f32.partialorder %v1077_v48, 0.0  ;;  %v1080_v49 = vmul.f32 0.01, %v1077_v48 }
 0x573   :  { %v1081_v50 = vsel %vm1079_vm8, %v1077_v48, %v1080_v49 }
 0x574   :  { %1742 = vmatmul.msk.f32.vlgmr.msrb.gmra.mxu2 %vm218_vm0, %v1081_v50 }
 0x5f7   :  { %v1111_v59 = vpop.f32.mrf.mxu2 }
 0x5f8   :  { %v1112_v60 = vadd.f32 %v1862_v58, %v1111_v59 }
 0x5fa   :  { %v1114_v61 = vmul.f32 0.5, %v1112_v60 }
 0x5fc   :  { %1864 = vtanh.f32 %v1114_v61 }
 0x602   :  { %v1865_v62 = vpop.eup %1864 }
 0x603   :  { %v1116_v63 = vadd.f32 1.0, %v1865_v62 }
 0x605   :  { %v1117_v1 = vmul.f32 0.5, %v1116_v63 }
 0x607   :  { %v1121_v2 = vmul.f32 %v1863_v0, %v1117_v1 }
 0x609   :  { %1272 = vperm.xlu2 %1851, %v1121_v2   ;;  %1186 = vperm.xlu1 %1849, %v1121_v2  }
 0x60a   :  { %1172 = vperm.xlu0 %1847, %v1121_v2  }
 0x611   :  { %1852 = vset.pattern.permute.xlu2 %v1873_v3  ;;  %1850 = vset.pattern.permute.xlu1 %v1874_v4 }
 0x612   :  { %1848 = vset.pattern.permute.xlu0 %v1875_v5  ;;  %1280 = vperm.xlu2 %1852, %v1121_v2  }
 0x613   :  { %1239 = vperm.xlu1 %1850, %v1121_v2   ;;  %1180 = vperm.xlu0 %1848, %v1121_v2  }
 0x61a   :  { %1854 = vset.pattern.permute.xlu2 %v1876_v6 }
 0x61b   :  { %1853 = vset.pattern.permute.xlu1 %v1877_v7  ;;  %1855 = vset.pattern.permute.xlu0 %v1878_v8 }
 0x61c   :  { %1337 = vperm.xlu2 %1854, %v1121_v2   ;;  %1286 = vperm.xlu1 %1853, %v1121_v2  }
 0x61d   :  { %1370 = vperm.xlu0 %1855, %v1121_v2  }
 0x624   :  { %1857 = vset.pattern.permute.xlu2 %v1879_v9  ;;  %1856 = vset.pattern.permute.xlu1 %v1880_v10 }
 0x625   :  { %1384 = vperm.xlu2 %1857, %v1121_v2   ;;  %1378 = vperm.xlu1 %1856, %v1121_v2  }
 0x626   :  { %1858 = vset.pattern.permute.xlu0 %v1879_v9 }
 0x663   :  { %v1273_v43 = vpop.permute.xlu2 %1272 }
 0x66c   :  { %v1281_v56 = vpop.permute.xlu2 %1280 }
 0x676   :  { %v1338_v5 = vpop.permute.xlu2 %1337 }
 0x67b   :  { %v1187_v36 = vpop.permute.xlu1 %1186 }
 0x67c   :  { %v1173_v27 = vpop.permute.xlu0 %1172 }
 0x67d   :  { %v1175_v22 = vmul.f32 %v1173_v27, %v1168_v24 }
 0x67f   :  { %v1176_v31 = vadd.f32 %v1175_v22, %v1169_v28  ;;  %v1385_v21 = vpop.permute.xlu2 %1384 }
 0x681   :  { %v1178_v33 = vadd.f32 %v1177_v32, %v1176_v31 }
 0x685   :  { %v1181_v15 = vpop.permute.xlu0 %1180  ;;  %v1240_v47 = vpop.permute.xlu1 %1239 }
 0x686   :  { %v1183_v34 = vmul.f32 %v1181_v15, %v1138_v12 }
 0x688   :  { %v1184_v35 = vadd.f32 %v1183_v34, %v1178_v33 }
 0x68a   :  { %v1189_v37 = vmul.f32 %v1187_v36, %v1184_v35 }
 0x68c   :  { %v1190_v38 = vsub.f32 %v2360_v54, %v1189_v37 }
 0x68e   :  { %1744 = vmatmul.msk.f32.vlgmr.msra.gmra.mxu0 %vm218_vm0, %v1190_v38  ;;  %1745 = vmatmul.msk.f32.vlgmr.msra.gmra.mxu1 %vm218_vm0, %v1190_v38  ;;  %1245 = vst.msk [vmem:[%s2449_s5] sm:$0x3] %vm1244_vm11, %v1190_v38  ;;  %vm1267_vm13 = vcmp.lt.f32.partialorder %v1190_v38, 0.0  ;;  %vm1266_vm14 = vcmp.gt.f32.partialorder %v1190_v38, 0.0  ;;  %v1287_v60 = vpop.permute.xlu1 %1286 }
 0x68f   :  { %1746 = vmatmul.msk.f32.vlgmr.msra.gmra.mxu2 %vm218_vm0, %v1190_v38  ;;  %v1268_v46 = vsel %vm1267_vm13, -1.0, %v1881_v23  ;;  %v1371_v9 = vpop.permute.xlu0 %1370 }
 0x690   :  { %v1269_v49 = vsel %vm1266_vm14, 1.0, %v1268_v46 }
 0x691   :  { %v1275_v53 = vmul.f32 %v1273_v43, %v1269_v49 }
 0x697   :  { %v1379_v16 = vpop.permute.xlu1 %1378 }
 0x70b   :  { %v1211_v41 = vpop.f32.mrf.mxu0  ;;  %v1231_v42 = vpop.f32.mrf.mxu1 }
 0x70c   :  { %v1236_v44 = vsel %vm1141_vm12, %v1211_v41, %v1231_v42 }
 0x70d   :  { %v1237_v45 = vmul.f32 2.0, %v1236_v44 }
 0x70f   :  { %v1242_v48 = vmul.f32 %v1240_v47, %v1237_v45  ;;  %v1283_v57 = vmul.f32 %v1281_v56, %v1237_v45 }
 0x711   :  { %v1243_v50 = vadd.f32 %v1242_v48, %v1137_v30 }
 0x712   :  { %v1263_v51 = vpop.f32.mrf.mxu2 }
 0x713   :  { %v1270_v52 = vsub.f32 %v1263_v51, %v2404_v25  ;;  %v1277_v54 = vmul.f32 %v1243_v50, %v2410_v29 }
 0x715   :  { %v1276_v55 = vadd.f32 %v1275_v53, %v1270_v52 }
 0x717   :  { %v1278_v58 = vadd.f32 %v1277_v54, %v1276_v55 }
 0x719   :  { %v1284_v59 = vadd.f32 %v1283_v57, %v1278_v58 }
 0x71b   :  { %v1289_v61 = vmul.f32 %v1287_v60, %v1284_v59 }
 0x71d   :  { %v1290_v62 = vsub.f32 %v1190_v38, %v1289_v61 }
 0x71f   :  { %1747 = vmatmul.msk.f32.vlgmr.msrb.gmra.mxu3 %vm218_vm0, %v1290_v62  ;;  %1748 = vmatmul.msk.f32.vlgmr.msrb.gmra.mxu0 %vm218_vm0, %v1290_v62  ;;  %1749 = vst.msk [vmem:[%s2449_s5 + $0x2] sm:$0x3] %vm1244_vm11, %v1290_v62  ;;  %vm1365_vm15 = vcmp.lt.f32.partialorder %v1290_v62, 0.0  ;;  %vm1364_vm1 = vcmp.gt.f32.partialorder %v1290_v62, 0.0 }
 0x720   :  { %1750 = vmatmul.msk.f32.vlgmr.msrb.gmra.mxu1 %vm218_vm0, %v1290_v62  ;;  %v1366_v0 = vsel %vm1365_vm15, -1.0, %v1881_v23 }
 0x721   :  { %v1367_v6 = vsel %vm1364_vm1, 1.0, %v1366_v0 }
 0x722   :  { %v1373_v10 = vmul.f32 %v1371_v9, %v1367_v6 }
 0x79c   :  { %v1331_v63 = vpop.f32.mrf.mxu0 }
 0x79d   :  { %v1361_v2 = vpop.f32.mrf.mxu1 }
 0x79e   :  { %v1368_v7 = vsub.f32 %v1361_v2, %v2404_v25 }
 0x7a0   :  { %v1374_v13 = vadd.f32 %v1373_v10, %v1368_v7 }
 0x7a2   :  { %v1311_v1 = vpop.f32.mrf.mxu3 }
 0x7a3   :  { %v1334_v3 = vsel %vm1141_vm12, %v1311_v1, %v1331_v63 }
 0x7a4   :  { %v1335_v4 = vmul.f32 2.0, %v1334_v3 }
 0x7a6   :  { %v1340_v8 = vmul.f32 %v1338_v5, %v1335_v4  ;;  %v1381_v19 = vmul.f32 %v1379_v16, %v1335_v4 }
 0x7a8   :  { %v1341_v11 = vadd.f32 %v1340_v8, %v1243_v50 }
 0x7aa   :  { %v1375_v14 = vmul.f32 %v1341_v11, %v2410_v29 }
 0x7ac   :  { %v1376_v18 = vadd.f32 %v1375_v14, %v1374_v13 }
 0x7ae   :  { %v1382_v20 = vadd.f32 %v1381_v19, %v1376_v18 }
 0x7b0   :  { %v1387_v23 = vmul.f32 %v1385_v21, %v1382_v20 }
 0x7b2   :  { %v1388_v17 = vsub.f32 %v1290_v62, %v1387_v23 }
 0x7b4   :  { %1751 = vst.msk [vmem:[%s2449_s5 + $0x4] sm:$0x3] %vm1244_vm11, %v1388_v17 }
 0x7b5   :  { %1395 = vsyncmov [#allocation5] }
 0x7b8   :  { %s1396_s1 = vpop.sfrf %1395 }
 0x7b9   :  { %p1752_p0 = scmp.ne.s32.totalorder %s1396_s1, 0 }
 0x7bb   :  { %1400 = shalt.err (%p1752_p0)  }
 0x7bc   :  { %1402 = vsyncmov [#allocation5 + $0x1] }
 0x7bf   :  { %s1403_s26 = vpop.sfrf %1402 }
 0x7c0   :  { %p1753_p1 = scmp.ne.s32.totalorder %s1403_s26, 0 }
 0x7c2   :  { %1407 = shalt.err (%p1753_p1)  }

</bundles_post_ra>
